<compile_context>
chip_gen: v5e
topology: v5e:2x2
jax: 0.10.0
libtpu: 0.0.40
codegen_flags: <defaults>
</compile_context>

<pallas_src>
import functools

import jax
import jax.numpy as jnp
import numpy as np
from jax.experimental import pallas as pl
from jax.experimental.pallas import tpu as pltpu

# ----------------------- model hyper-parameters -----------------------------
D_TOKEN = 32
N_HEADS = 4
D_HEAD = D_TOKEN // N_HEADS
FFN_D_HIDDEN = 64
N_BLOCKS = 2
LN_EPS = 1e-5

B, S = 2, 8  # (n_objects, n_tokens)


# ----------------------------- Pallas kernel --------------------------------
def _layernorm(x, g, b):
    mu = jnp.mean(x, axis=-1, keepdims=True)
    var = jnp.mean((x - mu) ** 2, axis=-1, keepdims=True)
    return (x - mu) * jax.lax.rsqrt(var + LN_EPS) * g + b


def transformer_kernel(
    x_ref,
    ln1_g_ref, ln1_b_ref,
    wqkv_ref, bqkv_ref, wo_ref, bo_ref,
    ln2_g_ref, ln2_b_ref,
    w1_ref, b1_ref, w2_ref, b2_ref,
    out_ref,
    o_scratch,
    *, n_blocks, n_heads, d_head, d_hidden,
):
    """All prenorm transformer blocks fused, for one batch element."""
    d = n_heads * d_head
    x = x_ref[0]  # (S, D)

    for blk in range(n_blocks):  # static loop over blocks, x stays in VMEM/vregs
        # ---------------- attention sub-block ----------------
        # prenormalization=True, first_prenormalization=False:
        # block 0 has no attention_normalization module.
        if blk == 0:
            xr = x
        else:
            xr = _layernorm(x, ln1_g_ref[blk], ln1_b_ref[blk])

        # Fused QKV projection; 1/sqrt(d_head) already folded into Wq/bq.
        qkv = (jnp.dot(xr, wqkv_ref[blk], preferred_element_type=jnp.float32)
               + bqkv_ref[blk])
        q = qkv[:, 0 * d:1 * d]
        k = qkv[:, 1 * d:2 * d]
        v = qkv[:, 2 * d:3 * d]

        for h in range(n_heads):  # static loop over heads
            sl = slice(h * d_head, (h + 1) * d_head)
            qh, kh, vh = q[:, sl], k[:, sl], v[:, sl]
            logits = jnp.dot(qh, kh.T, preferred_element_type=jnp.float32)
            m = jnp.max(logits, axis=-1, keepdims=True)
            p = jnp.exp(logits - m)
            denom = jnp.sum(p, axis=-1, keepdims=True)
            p = p * pl.reciprocal(denom, approx=True)  # EUP, not VALU divide
            o_scratch[:, sl] = jnp.dot(p, vh, preferred_element_type=jnp.float32)

        # Single full-width output projection (instead of per-head accumulation).
        attn_out = (jnp.dot(o_scratch[...], wo_ref[blk],
                            preferred_element_type=jnp.float32) + bo_ref[blk])
        x = x + attn_out  # residual (dropout=0 -> identity)

        # ---------------- FFN sub-block (ReGLU) ----------------
        xr = _layernorm(x, ln2_g_ref[blk], ln2_b_ref[blk])
        h1 = (jnp.dot(xr, w1_ref[blk], preferred_element_type=jnp.float32)
              + b1_ref[blk])
        a = h1[:, :d_hidden]
        g = h1[:, d_hidden:]
        y = (jnp.dot(a * jnp.maximum(g, 0.0), w2_ref[blk],
                     preferred_element_type=jnp.float32) + b2_ref[blk])
        x = x + y  # residual (dropout=0 -> identity)

    out_ref[0] = x


# --------------------- parameter packing for the kernel ----------------------
def pack_params(all_params):
    """Stack per-block module params into fused, kernel-ready arrays.

    - wq|wk|wv are concatenated into one (D, 3D) weight (one bias too).
    - the 1/sqrt(d_head) attention scale is folded into Wq/bq here (offline).
    - everything is stacked along a leading n_blocks axis so the whole forward
      runs from a single pallas_call.
    """
    scale = 1.0 / np.sqrt(D_HEAD)

    def stk(fn):
        return jnp.stack([fn(p) for p in all_params])

    ln1_g = stk(lambda p: p[0])
    ln1_b = stk(lambda p: p[1])
    wqkv = stk(lambda p: jnp.concatenate([p[2] * scale, p[4], p[6]], axis=1))
    bqkv = stk(lambda p: jnp.concatenate([p[3] * scale, p[5], p[7]], axis=1))
    wo = stk(lambda p: p[8])
    bo = stk(lambda p: p[9])
    ln2_g = stk(lambda p: p[10])
    ln2_b = stk(lambda p: p[11])
    w1 = stk(lambda p: p[12])
    b1 = stk(lambda p: p[13])
    w2 = stk(lambda p: p[14])
    b2 = stk(lambda p: p[15])
    return (ln1_g, ln1_b, wqkv, bqkv, wo, bo, ln2_g, ln2_b, w1, b1, w2, b2)


def transformer_forward_pallas(x, all_params):
    """Full Transformer forward (all blocks) in one pallas_call."""
    Bn, Sn, Dn = x.shape
    packed = pack_params(all_params)

    kern = functools.partial(
        transformer_kernel,
        n_blocks=len(all_params), n_heads=N_HEADS, d_head=D_HEAD,
        d_hidden=FFN_D_HIDDEN,
    )

    def full_spec(arr):
        nd = arr.ndim
        return pl.BlockSpec(arr.shape, lambda b, _nd=nd: (0,) * _nd)

    in_specs = [pl.BlockSpec((1, Sn, Dn), lambda b: (b, 0, 0))]
    in_specs += [full_spec(p) for p in packed]
    out_specs = pl.BlockSpec((1, Sn, Dn), lambda b: (b, 0, 0))

    return pl.pallas_call(
        kern,
        out_shape=jax.ShapeDtypeStruct((Bn, Sn, Dn), jnp.float32),
        grid=(Bn,),
        in_specs=in_specs,
        out_specs=out_specs,
        scratch_shapes=[pltpu.VMEM((Sn, Dn), jnp.float32)],
        compiler_params=pltpu.CompilerParams(dimension_semantics=("parallel",)),
    )(x, *packed)


# ----------------------------- JAX reference ---------------------------------
def _layernorm_ref(x, g, b):
    mu = x.mean(-1, keepdims=True)
    var = ((x - mu) ** 2).mean(-1, keepdims=True)
    return (x - mu) / jnp.sqrt(var + LN_EPS) * g + b


def block_ref(x, params, has_attn_norm):
    (ln1g, ln1b, wq, bq, wk, bk, wv, bv, wo, bo,
     ln2g, ln2b, w1, b1, w2, b2) = params
    xr = _layernorm_ref(x, ln1g[0], ln1b[0]) if has_attn_norm else x
    q = xr @ wq + bq[0]
    k = xr @ wk + bk[0]
    v = xr @ wv + bv[0]
    Bn, Sn, Dn = x.shape
    qh = q.reshape(Bn, Sn, N_HEADS, D_HEAD).transpose(0, 2, 1, 3)
    kh = k.reshape(Bn, Sn, N_HEADS, D_HEAD).transpose(0, 2, 1, 3)
    vh = v.reshape(Bn, Sn, N_HEADS, D_HEAD).transpose(0, 2, 1, 3)
    logits = jnp.einsum("bhqd,bhkd->bhqk", qh, kh) / np.sqrt(D_HEAD)
    p = jax.nn.softmax(logits, axis=-1)
    o = jnp.einsum("bhqk,bhkd->bhqd", p, vh).transpose(0, 2, 1, 3).reshape(Bn, Sn, Dn)
    o = o @ wo + bo[0]
    x = x + o
    xr = _layernorm_ref(x, ln2g[0], ln2b[0])
    h1 = xr @ w1 + b1[0]
    a, g = h1[..., :FFN_D_HIDDEN], h1[..., FFN_D_HIDDEN:]
    y = (a * jnp.maximum(g, 0.0)) @ w2 + b2[0]
    return x + y


def transformer_forward_ref(x, all_params):
    for layer_idx, params in enumerate(all_params):
        x = block_ref(x, params, layer_idx != 0)
    return x


# ----------------------------- parameter init --------------------------------
def init_block_params(key):
    ks = jax.random.split(key, 8)
    scale = 0.05

    def lin_w(k, din, dout):  # already transposed: (din, dout), kernel does x @ W
        return jax.random.normal(k, (din, dout), jnp.float32) * scale

    ln1_g = jnp.ones((1, D_TOKEN), jnp.float32)
    ln1_b = jnp.zeros((1, D_TOKEN), jnp.float32)
    wq = lin_w(ks[0], D_TOKEN, D_TOKEN)
    bq = jnp.zeros((1, D_TOKEN), jnp.float32)
    wk = lin_w(ks[1], D_TOKEN, D_TOKEN)
    bk = jnp.zeros((1, D_TOKEN), jnp.float32)
    wv = lin_w(ks[2], D_TOKEN, D_TOKEN)
    bv = jnp.zeros((1, D_TOKEN), jnp.float32)
    wo = lin_w(ks[3], D_TOKEN, D_TOKEN)
    bo = jnp.zeros((1, D_TOKEN), jnp.float32)
    ln2_g = jnp.ones((1, D_TOKEN), jnp.float32)
    ln2_b = jnp.zeros((1, D_TOKEN), jnp.float32)
    w1 = lin_w(ks[4], D_TOKEN, 2 * FFN_D_HIDDEN)  # ReGLU -> 2 * d_hidden
    b1 = jax.random.normal(ks[5], (1, 2 * FFN_D_HIDDEN), jnp.float32) * scale
    w2 = lin_w(ks[6], FFN_D_HIDDEN, D_TOKEN)
    b2 = jax.random.normal(ks[7], (1, D_TOKEN), jnp.float32) * scale
    return (ln1_g, ln1_b, wq, bq, wk, bk, wv, bv, wo, bo,
            ln2_g, ln2_b, w1, b1, w2, b2)


# --------------------------------- main ---------------------------------------
if __name__ == "__main__":
    key = jax.random.PRNGKey(0)
    kx, *kblocks = jax.random.split(key, 1 + N_BLOCKS)

    x = jax.random.normal(kx, (B, S, D_TOKEN), jnp.float32)
    all_params = [init_block_params(kb) for kb in kblocks]

    out = transformer_forward_pallas(x, all_params)
    out = jax.block_until_ready(out)

    ref = transformer_forward_ref(x, all_params)
    ref = jax.block_until_ready(ref)

    assert out.shape == (B, S, D_TOKEN)
    # Tolerance slightly relaxed vs. 1e-4: the softmax denominator uses the
    # EUP approximate reciprocal (pl.reciprocal(approx=True)); everything else
    # matches the reference exactly up to fp32 rounding.
    np.testing.assert_allclose(np.asarray(out), np.asarray(ref), rtol=2e-3, atol=2e-3)

    # TODO(synk): dropout layers (attention/ffn/residual) are identity here
    # (eval mode / p=0); kv compression and last_layer_query_idx slicing are
    # disabled (None), matching the default FT-Transformer configuration.
    print("KERNEL_OK")
</pallas_src>

<mosaic_0001>
module attributes {stable_mosaic.version = 11 : i64} {
  func.func @transformer_kernel(%arg0: i32, %arg1: memref<1x8x32xf32, #tpu.memory_space<vmem>>, %arg2: memref<2x1x32xf32, #tpu.memory_space<vmem>>, %arg3: memref<2x1x32xf32, #tpu.memory_space<vmem>>, %arg4: memref<2x32x96xf32, #tpu.memory_space<vmem>>, %arg5: memref<2x1x96xf32, #tpu.memory_space<vmem>>, %arg6: memref<2x32x32xf32, #tpu.memory_space<vmem>>, %arg7: memref<2x1x32xf32, #tpu.memory_space<vmem>>, %arg8: memref<2x1x32xf32, #tpu.memory_space<vmem>>, %arg9: memref<2x1x32xf32, #tpu.memory_space<vmem>>, %arg10: memref<2x32x128xf32, #tpu.memory_space<vmem>>, %arg11: memref<2x1x128xf32, #tpu.memory_space<vmem>>, %arg12: memref<2x64x32xf32, #tpu.memory_space<vmem>>, %arg13: memref<2x1x32xf32, #tpu.memory_space<vmem>>, %arg14: memref<1x8x32xf32, #tpu.memory_space<vmem>>, %arg15: memref<8x32xf32, #tpu.memory_space<vmem>>) attributes {dimension_semantics = [#tpu.dimension_semantics<parallel>], iteration_bounds = array<i64: 2>, scalar_prefetch = 0 : i64, scratch_operands = 1 : i64, tpu.core_type = #tpu.core_type<tc>, window_params = [{transform_indices = @transform_0, window_bounds = array<i64: 1, 8, 32>}, {pipeline_mode = #tpu.pipeline_mode<synchronous>, transform_indices = @transform_1, window_bounds = array<i64: 2, 1, 32>}, {pipeline_mode = #tpu.pipeline_mode<synchronous>, transform_indices = @transform_2, window_bounds = array<i64: 2, 1, 32>}, {pipeline_mode = #tpu.pipeline_mode<synchronous>, transform_indices = @transform_3, window_bounds = array<i64: 2, 32, 96>}, {pipeline_mode = #tpu.pipeline_mode<synchronous>, transform_indices = @transform_4, window_bounds = array<i64: 2, 1, 96>}, {pipeline_mode = #tpu.pipeline_mode<synchronous>, transform_indices = @transform_5, window_bounds = array<i64: 2, 32, 32>}, {pipeline_mode = #tpu.pipeline_mode<synchronous>, transform_indices = @transform_6, window_bounds = array<i64: 2, 1, 32>}, {pipeline_mode = #tpu.pipeline_mode<synchronous>, transform_indices = @transform_7, window_bounds = array<i64: 2, 1, 32>}, {pipeline_mode = #tpu.pipeline_mode<synchronous>, transform_indices = @transform_8, window_bounds = array<i64: 2, 1, 32>}, {pipeline_mode = #tpu.pipeline_mode<synchronous>, transform_indices = @transform_9, window_bounds = array<i64: 2, 32, 128>}, {pipeline_mode = #tpu.pipeline_mode<synchronous>, transform_indices = @transform_10, window_bounds = array<i64: 2, 1, 128>}, {pipeline_mode = #tpu.pipeline_mode<synchronous>, transform_indices = @transform_11, window_bounds = array<i64: 2, 64, 32>}, {pipeline_mode = #tpu.pipeline_mode<synchronous>, transform_indices = @transform_12, window_bounds = array<i64: 2, 1, 32>}, {transform_indices = @transform_13, window_bounds = array<i64: 1, 8, 32>}]} {
    %c0 = arith.constant 0 : index
    %c0_0 = arith.constant 0 : index
    %c0_1 = arith.constant 0 : index
    %0 = vector.load %arg1[%c0, %c0_0, %c0_1] : memref<1x8x32xf32, #tpu.memory_space<vmem>>, vector<1x8x32xf32>
    %1 = vector.shape_cast %0 : vector<1x8x32xf32> to vector<8x32xf32>
    %c0_2 = arith.constant 0 : index
    %c0_3 = arith.constant 0 : index
    %c0_4 = arith.constant 0 : index
    %2 = vector.load %arg4[%c0_2, %c0_3, %c0_4] : memref<2x32x96xf32, #tpu.memory_space<vmem>>, vector<1x32x96xf32>
    %3 = vector.shape_cast %2 : vector<1x32x96xf32> to vector<32x96xf32>
    %cst = arith.constant dense<0.000000e+00> : vector<8x96xf32>
    %4 = tpu.matmul %1, %3, %cst {dimension_numbers = #tpu.dot_dimension_numbers<[1], [0], [0], [1], [0, 0, 1, 1], [], []>} : vector<8x32xf32>, vector<32x96xf32>, vector<8x96xf32> -> vector<8x96xf32>
    %c0_5 = arith.constant 0 : index
    %c0_6 = arith.constant 0 : index
    %c0_7 = arith.constant 0 : index
    %5 = vector.load %arg5[%c0_5, %c0_6, %c0_7] : memref<2x1x96xf32, #tpu.memory_space<vmem>>, vector<1x1x96xf32>
    %6 = vector.shape_cast %5 : vector<1x1x96xf32> to vector<1x96xf32>
    %7 = vector.broadcast %6 : vector<1x96xf32> to vector<8x96xf32>
    %8 = arith.addf %4, %7 : vector<8x96xf32>
    %9 = vector.extract_strided_slice %8 {offsets = [0, 0], sizes = [8, 32], strides = [1, 1]} : vector<8x96xf32> to vector<8x32xf32>
    %10 = vector.extract_strided_slice %8 {offsets = [0, 32], sizes = [8, 32], strides = [1, 1]} : vector<8x96xf32> to vector<8x32xf32>
    %11 = vector.extract_strided_slice %8 {offsets = [0, 64], sizes = [8, 32], strides = [1, 1]} : vector<8x96xf32> to vector<8x32xf32>
    %12 = vector.extract_strided_slice %9 {offsets = [0, 0], sizes = [8, 8], strides = [1, 1]} : vector<8x32xf32> to vector<8x8xf32>
    %13 = vector.extract_strided_slice %10 {offsets = [0, 0], sizes = [8, 8], strides = [1, 1]} : vector<8x32xf32> to vector<8x8xf32>
    %14 = vector.extract_strided_slice %11 {offsets = [0, 0], sizes = [8, 8], strides = [1, 1]} : vector<8x32xf32> to vector<8x8xf32>
    %15 = tpu.transpose %13, [1, 0] : vector<8x8xf32> -> vector<8x8xf32>
    %cst_8 = arith.constant dense<0.000000e+00> : vector<8x8xf32>
    %16 = tpu.matmul %12, %15, %cst_8 {dimension_numbers = #tpu.dot_dimension_numbers<[1], [0], [0], [1], [0, 0, 1, 1], [], []>} : vector<8x8xf32>, vector<8x8xf32>, vector<8x8xf32> -> vector<8x8xf32>
    %cst_9 = arith.constant dense<0xFF800000> : vector<8xf32>
    %17 = vector.multi_reduction <maximumf>, %16, %cst_9 [1] : vector<8x8xf32> to vector<8xf32>
    %18 = vector.shape_cast %17 : vector<8xf32> to vector<8x1xf32>
    %19 = vector.broadcast %18 : vector<8x1xf32> to vector<8x8xf32>
    %20 = arith.subf %16, %19 : vector<8x8xf32>
    %21 = math.exp %20 : vector<8x8xf32>
    %cst_10 = arith.constant dense<0.000000e+00> : vector<8xf32>
    %22 = vector.multi_reduction <add>, %21, %cst_10 [1] : vector<8x8xf32> to vector<8xf32>
    %23 = vector.shape_cast %22 : vector<8xf32> to vector<8x1xf32>
    %24 = tpu.reciprocal %23 {approx = true} : vector<8x1xf32> -> vector<8x1xf32>
    %25 = vector.broadcast %24 : vector<8x1xf32> to vector<8x8xf32>
    %26 = arith.mulf %21, %25 : vector<8x8xf32>
    %cst_11 = arith.constant dense<0.000000e+00> : vector<8x8xf32>
    %27 = tpu.matmul %26, %14, %cst_11 {dimension_numbers = #tpu.dot_dimension_numbers<[1], [0], [0], [1], [0, 0, 1, 1], [], []>} : vector<8x8xf32>, vector<8x8xf32>, vector<8x8xf32> -> vector<8x8xf32>
    %c0_12 = arith.constant 0 : index
    %c0_13 = arith.constant 0 : index
    %28 = vector.load %arg15[%c0_12, %c0_13] : memref<8x32xf32, #tpu.memory_space<vmem>>, vector<8x8xf32>
    tpu.vector_store %arg15[%c0_12, %c0_13], %27 {strides = array<i32>} : memref<8x32xf32, #tpu.memory_space<vmem>>, vector<8x8xf32>,
    %29 = vector.extract_strided_slice %9 {offsets = [0, 8], sizes = [8, 8], strides = [1, 1]} : vector<8x32xf32> to vector<8x8xf32>
    %30 = vector.extract_strided_slice %10 {offsets = [0, 8], sizes = [8, 8], strides = [1, 1]} : vector<8x32xf32> to vector<8x8xf32>
    %31 = vector.extract_strided_slice %11 {offsets = [0, 8], sizes = [8, 8], strides = [1, 1]} : vector<8x32xf32> to vector<8x8xf32>
    %32 = tpu.transpose %30, [1, 0] : vector<8x8xf32> -> vector<8x8xf32>
    %cst_14 = arith.constant dense<0.000000e+00> : vector<8x8xf32>
    %33 = tpu.matmul %29, %32, %cst_14 {dimension_numbers = #tpu.dot_dimension_numbers<[1], [0], [0], [1], [0, 0, 1, 1], [], []>} : vector<8x8xf32>, vector<8x8xf32>, vector<8x8xf32> -> vector<8x8xf32>
    %cst_15 = arith.constant dense<0xFF800000> : vector<8xf32>
    %34 = vector.multi_reduction <maximumf>, %33, %cst_15 [1] : vector<8x8xf32> to vector<8xf32>
    %35 = vector.shape_cast %34 : vector<8xf32> to vector<8x1xf32>
    %36 = vector.broadcast %35 : vector<8x1xf32> to vector<8x8xf32>
    %37 = arith.subf %33, %36 : vector<8x8xf32>
    %38 = math.exp %37 : vector<8x8xf32>
    %cst_16 = arith.constant dense<0.000000e+00> : vector<8xf32>
    %39 = vector.multi_reduction <add>, %38, %cst_16 [1] : vector<8x8xf32> to vector<8xf32>
    %40 = vector.shape_cast %39 : vector<8xf32> to vector<8x1xf32>
    %41 = tpu.reciprocal %40 {approx = true} : vector<8x1xf32> -> vector<8x1xf32>
    %42 = vector.broadcast %41 : vector<8x1xf32> to vector<8x8xf32>
    %43 = arith.mulf %38, %42 : vector<8x8xf32>
    %cst_17 = arith.constant dense<0.000000e+00> : vector<8x8xf32>
    %44 = tpu.matmul %43, %31, %cst_17 {dimension_numbers = #tpu.dot_dimension_numbers<[1], [0], [0], [1], [0, 0, 1, 1], [], []>} : vector<8x8xf32>, vector<8x8xf32>, vector<8x8xf32> -> vector<8x8xf32>
    %c0_18 = arith.constant 0 : index
    %c8 = arith.constant 8 : index
    %45 = vector.load %arg15[%c0_18, %c8] : memref<8x32xf32, #tpu.memory_space<vmem>>, vector<8x8xf32>
    tpu.vector_store %arg15[%c0_18, %c8], %44 {strides = array<i32>} : memref<8x32xf32, #tpu.memory_space<vmem>>, vector<8x8xf32>,
    %46 = vector.extract_strided_slice %9 {offsets = [0, 16], sizes = [8, 8], strides = [1, 1]} : vector<8x32xf32> to vector<8x8xf32>
    %47 = vector.extract_strided_slice %10 {offsets = [0, 16], sizes = [8, 8], strides = [1, 1]} : vector<8x32xf32> to vector<8x8xf32>
    %48 = vector.extract_strided_slice %11 {offsets = [0, 16], sizes = [8, 8], strides = [1, 1]} : vector<8x32xf32> to vector<8x8xf32>
    %49 = tpu.transpose %47, [1, 0] : vector<8x8xf32> -> vector<8x8xf32>
    %cst_19 = arith.constant dense<0.000000e+00> : vector<8x8xf32>
    %50 = tpu.matmul %46, %49, %cst_19 {dimension_numbers = #tpu.dot_dimension_numbers<[1], [0], [0], [1], [0, 0, 1, 1], [], []>} : vector<8x8xf32>, vector<8x8xf32>, vector<8x8xf32> -> vector<8x8xf32>
    %cst_20 = arith.constant dense<0xFF800000> : vector<8xf32>
    %51 = vector.multi_reduction <maximumf>, %50, %cst_20 [1] : vector<8x8xf32> to vector<8xf32>
    %52 = vector.shape_cast %51 : vector<8xf32> to vector<8x1xf32>
    %53 = vector.broadcast %52 : vector<8x1xf32> to vector<8x8xf32>
    %54 = arith.subf %50, %53 : vector<8x8xf32>
    %55 = math.exp %54 : vector<8x8xf32>
    %cst_21 = arith.constant dense<0.000000e+00> : vector<8xf32>
    %56 = vector.multi_reduction <add>, %55, %cst_21 [1] : vector<8x8xf32> to vector<8xf32>
    %57 = vector.shape_cast %56 : vector<8xf32> to vector<8x1xf32>
    %58 = tpu.reciprocal %57 {approx = true} : vector<8x1xf32> -> vector<8x1xf32>
    %59 = vector.broadcast %58 : vector<8x1xf32> to vector<8x8xf32>
    %60 = arith.mulf %55, %59 : vector<8x8xf32>
    %cst_22 = arith.constant dense<0.000000e+00> : vector<8x8xf32>
    %61 = tpu.matmul %60, %48, %cst_22 {dimension_numbers = #tpu.dot_dimension_numbers<[1], [0], [0], [1], [0, 0, 1, 1], [], []>} : vector<8x8xf32>, vector<8x8xf32>, vector<8x8xf32> -> vector<8x8xf32>
    %c0_23 = arith.constant 0 : index
    %c16 = arith.constant 16 : index
    %62 = vector.load %arg15[%c0_23, %c16] : memref<8x32xf32, #tpu.memory_space<vmem>>, vector<8x8xf32>
    tpu.vector_store %arg15[%c0_23, %c16], %61 {strides = array<i32>} : memref<8x32xf32, #tpu.memory_space<vmem>>, vector<8x8xf32>,
    %63 = vector.extract_strided_slice %9 {offsets = [0, 24], sizes = [8, 8], strides = [1, 1]} : vector<8x32xf32> to vector<8x8xf32>
    %64 = vector.extract_strided_slice %10 {offsets = [0, 24], sizes = [8, 8], strides = [1, 1]} : vector<8x32xf32> to vector<8x8xf32>
    %65 = vector.extract_strided_slice %11 {offsets = [0, 24], sizes = [8, 8], strides = [1, 1]} : vector<8x32xf32> to vector<8x8xf32>
    %66 = tpu.transpose %64, [1, 0] : vector<8x8xf32> -> vector<8x8xf32>
    %cst_24 = arith.constant dense<0.000000e+00> : vector<8x8xf32>
    %67 = tpu.matmul %63, %66, %cst_24 {dimension_numbers = #tpu.dot_dimension_numbers<[1], [0], [0], [1], [0, 0, 1, 1], [], []>} : vector<8x8xf32>, vector<8x8xf32>, vector<8x8xf32> -> vector<8x8xf32>
    %cst_25 = arith.constant dense<0xFF800000> : vector<8xf32>
    %68 = vector.multi_reduction <maximumf>, %67, %cst_25 [1] : vector<8x8xf32> to vector<8xf32>
    %69 = vector.shape_cast %68 : vector<8xf32> to vector<8x1xf32>
    %70 = vector.broadcast %69 : vector<8x1xf32> to vector<8x8xf32>
    %71 = arith.subf %67, %70 : vector<8x8xf32>
    %72 = math.exp %71 : vector<8x8xf32>
    %cst_26 = arith.constant dense<0.000000e+00> : vector<8xf32>
    %73 = vector.multi_reduction <add>, %72, %cst_26 [1] : vector<8x8xf32> to vector<8xf32>
    %74 = vector.shape_cast %73 : vector<8xf32> to vector<8x1xf32>
    %75 = tpu.reciprocal %74 {approx = true} : vector<8x1xf32> -> vector<8x1xf32>
    %76 = vector.broadcast %75 : vector<8x1xf32> to vector<8x8xf32>
    %77 = arith.mulf %72, %76 : vector<8x8xf32>
    %cst_27 = arith.constant dense<0.000000e+00> : vector<8x8xf32>
    %78 = tpu.matmul %77, %65, %cst_27 {dimension_numbers = #tpu.dot_dimension_numbers<[1], [0], [0], [1], [0, 0, 1, 1], [], []>} : vector<8x8xf32>, vector<8x8xf32>, vector<8x8xf32> -> vector<8x8xf32>
    %c0_28 = arith.constant 0 : index
    %c24 = arith.constant 24 : index
    %79 = vector.load %arg15[%c0_28, %c24] : memref<8x32xf32, #tpu.memory_space<vmem>>, vector<8x8xf32>
    tpu.vector_store %arg15[%c0_28, %c24], %78 {strides = array<i32>} : memref<8x32xf32, #tpu.memory_space<vmem>>, vector<8x8xf32>,
    %c0_29 = arith.constant 0 : index
    %c0_30 = arith.constant 0 : index
    %80 = vector.load %arg15[%c0_29, %c0_30] : memref<8x32xf32, #tpu.memory_space<vmem>>, vector<8x32xf32>
    %c0_31 = arith.constant 0 : index
    %c0_32 = arith.constant 0 : index
    %c0_33 = arith.constant 0 : index
    %81 = vector.load %arg6[%c0_31, %c0_32, %c0_33] : memref<2x32x32xf32, #tpu.memory_space<vmem>>, vector<1x32x32xf32>
    %82 = vector.shape_cast %81 : vector<1x32x32xf32> to vector<32x32xf32>
    %cst_34 = arith.constant dense<0.000000e+00> : vector<8x32xf32>
    %83 = tpu.matmul %80, %82, %cst_34 {dimension_numbers = #tpu.dot_dimension_numbers<[1], [0], [0], [1], [0, 0, 1, 1], [], []>} : vector<8x32xf32>, vector<32x32xf32>, vector<8x32xf32> -> vector<8x32xf32>
    %c0_35 = arith.constant 0 : index
    %c0_36 = arith.constant 0 : index
    %c0_37 = arith.constant 0 : index
    %84 = vector.load %arg7[%c0_35, %c0_36, %c0_37] : memref<2x1x32xf32, #tpu.memory_space<vmem>>, vector<1x1x32xf32>
    %85 = vector.shape_cast %84 : vector<1x1x32xf32> to vector<1x32xf32>
    %86 = vector.broadcast %85 : vector<1x32xf32> to vector<8x32xf32>
    %87 = arith.addf %83, %86 : vector<8x32xf32>
    %88 = arith.addf %1, %87 : vector<8x32xf32>
    %c0_38 = arith.constant 0 : index
    %c0_39 = arith.constant 0 : index
    %c0_40 = arith.constant 0 : index
    %89 = vector.load %arg8[%c0_38, %c0_39, %c0_40] : memref<2x1x32xf32, #tpu.memory_space<vmem>>, vector<1x1x32xf32>
    %90 = vector.shape_cast %89 : vector<1x1x32xf32> to vector<1x32xf32>
    %c0_41 = arith.constant 0 : index
    %c0_42 = arith.constant 0 : index
    %c0_43 = arith.constant 0 : index
    %91 = vector.load %arg9[%c0_41, %c0_42, %c0_43] : memref<2x1x32xf32, #tpu.memory_space<vmem>>, vector<1x1x32xf32>
    %92 = vector.shape_cast %91 : vector<1x1x32xf32> to vector<1x32xf32>
    %cst_44 = arith.constant dense<0.000000e+00> : vector<8xf32>
    %93 = vector.multi_reduction <add>, %88, %cst_44 [1] : vector<8x32xf32> to vector<8xf32>
    %94 = vector.shape_cast %93 : vector<8xf32> to vector<8x1xf32>
    %cst_45 = arith.constant 3.200000e+01 : f32
    %95 = vector.broadcast %cst_45 : f32 to vector<8x1xf32>
    %96 = arith.divf %94, %95 : vector<8x1xf32>
    %97 = vector.broadcast %96 : vector<8x1xf32> to vector<8x32xf32>
    %98 = arith.subf %88, %97 : vector<8x32xf32>
    %99 = arith.mulf %98, %98 : vector<8x32xf32>
    %cst_46 = arith.constant dense<0.000000e+00> : vector<8xf32>
    %100 = vector.multi_reduction <add>, %99, %cst_46 [1] : vector<8x32xf32> to vector<8xf32>
    %101 = vector.shape_cast %100 : vector<8xf32> to vector<8x1xf32>
    %cst_47 = arith.constant 3.200000e+01 : f32
    %102 = vector.broadcast %cst_47 : f32 to vector<8x1xf32>
    %103 = arith.divf %101, %102 : vector<8x1xf32>
    %104 = vector.broadcast %96 : vector<8x1xf32> to vector<8x32xf32>
    %105 = arith.subf %88, %104 : vector<8x32xf32>
    %cst_48 = arith.constant 9.99999974E-6 : f32
    %106 = vector.broadcast %cst_48 : f32 to vector<8x1xf32>
    %107 = arith.addf %103, %106 : vector<8x1xf32>
    %108 = math.rsqrt %107 : vector<8x1xf32>
    %109 = vector.broadcast %108 : vector<8x1xf32> to vector<8x32xf32>
    %110 = arith.mulf %105, %109 : vector<8x32xf32>
    %111 = vector.broadcast %90 : vector<1x32xf32> to vector<8x32xf32>
    %112 = arith.mulf %110, %111 : vector<8x32xf32>
    %113 = vector.broadcast %92 : vector<1x32xf32> to vector<8x32xf32>
    %114 = arith.addf %112, %113 : vector<8x32xf32>
    %c0_49 = arith.constant 0 : index
    %c0_50 = arith.constant 0 : index
    %c0_51 = arith.constant 0 : index
    %115 = vector.load %arg10[%c0_49, %c0_50, %c0_51] : memref<2x32x128xf32, #tpu.memory_space<vmem>>, vector<1x32x128xf32>
    %116 = vector.shape_cast %115 : vector<1x32x128xf32> to vector<32x128xf32>
    %cst_52 = arith.constant dense<0.000000e+00> : vector<8x128xf32>
    %117 = tpu.matmul %114, %116, %cst_52 {dimension_numbers = #tpu.dot_dimension_numbers<[1], [0], [0], [1], [0, 0, 1, 1], [], []>} : vector<8x32xf32>, vector<32x128xf32>, vector<8x128xf32> -> vector<8x128xf32>
    %c0_53 = arith.constant 0 : index
    %c0_54 = arith.constant 0 : index
    %c0_55 = arith.constant 0 : index
    %118 = vector.load %arg11[%c0_53, %c0_54, %c0_55] : memref<2x1x128xf32, #tpu.memory_space<vmem>>, vector<1x1x128xf32>
    %119 = vector.shape_cast %118 : vector<1x1x128xf32> to vector<1x128xf32>
    %120 = vector.broadcast %119 : vector<1x128xf32> to vector<8x128xf32>
    %121 = arith.addf %117, %120 : vector<8x128xf32>
    %122 = vector.extract_strided_slice %121 {offsets = [0, 0], sizes = [8, 64], strides = [1, 1]} : vector<8x128xf32> to vector<8x64xf32>
    %123 = vector.extract_strided_slice %121 {offsets = [0, 64], sizes = [8, 64], strides = [1, 1]} : vector<8x128xf32> to vector<8x64xf32>
    %cst_56 = arith.constant 0.000000e+00 : f32
    %124 = vector.broadcast %cst_56 : f32 to vector<8x64xf32>
    %125 = arith.maximumf %123, %124 : vector<8x64xf32>
    %126 = arith.mulf %122, %125 : vector<8x64xf32>
    %c0_57 = arith.constant 0 : index
    %c0_58 = arith.constant 0 : index
    %c0_59 = arith.constant 0 : index
    %127 = vector.load %arg12[%c0_57, %c0_58, %c0_59] : memref<2x64x32xf32, #tpu.memory_space<vmem>>, vector<1x64x32xf32>
    %128 = vector.shape_cast %127 : vector<1x64x32xf32> to vector<64x32xf32>
    %cst_60 = arith.constant dense<0.000000e+00> : vector<8x32xf32>
    %129 = tpu.matmul %126, %128, %cst_60 {dimension_numbers = #tpu.dot_dimension_numbers<[1], [0], [0], [1], [0, 0, 1, 1], [], []>} : vector<8x64xf32>, vector<64x32xf32>, vector<8x32xf32> -> vector<8x32xf32>
    %c0_61 = arith.constant 0 : index
    %c0_62 = arith.constant 0 : index
    %c0_63 = arith.constant 0 : index
    %130 = vector.load %arg13[%c0_61, %c0_62, %c0_63] : memref<2x1x32xf32, #tpu.memory_space<vmem>>, vector<1x1x32xf32>
    %131 = vector.shape_cast %130 : vector<1x1x32xf32> to vector<1x32xf32>
    %132 = vector.broadcast %131 : vector<1x32xf32> to vector<8x32xf32>
    %133 = arith.addf %129, %132 : vector<8x32xf32>
    %134 = arith.addf %88, %133 : vector<8x32xf32>
    %c1 = arith.constant 1 : index
    %c0_64 = arith.constant 0 : index
    %c0_65 = arith.constant 0 : index
    %135 = vector.load %arg2[%c1, %c0_64, %c0_65] : memref<2x1x32xf32, #tpu.memory_space<vmem>>, vector<1x1x32xf32>
    %136 = vector.shape_cast %135 : vector<1x1x32xf32> to vector<1x32xf32>
    %c1_66 = arith.constant 1 : index
    %c0_67 = arith.constant 0 : index
    %c0_68 = arith.constant 0 : index
    %137 = vector.load %arg3[%c1_66, %c0_67, %c0_68] : memref<2x1x32xf32, #tpu.memory_space<vmem>>, vector<1x1x32xf32>
    %138 = vector.shape_cast %137 : vector<1x1x32xf32> to vector<1x32xf32>
    %cst_69 = arith.constant dense<0.000000e+00> : vector<8xf32>
    %139 = vector.multi_reduction <add>, %134, %cst_69 [1] : vector<8x32xf32> to vector<8xf32>
    %140 = vector.shape_cast %139 : vector<8xf32> to vector<8x1xf32>
    %cst_70 = arith.constant 3.200000e+01 : f32
    %141 = vector.broadcast %cst_70 : f32 to vector<8x1xf32>
    %142 = arith.divf %140, %141 : vector<8x1xf32>
    %143 = vector.broadcast %142 : vector<8x1xf32> to vector<8x32xf32>
    %144 = arith.subf %134, %143 : vector<8x32xf32>
    %145 = arith.mulf %144, %144 : vector<8x32xf32>
    %cst_71 = arith.constant dense<0.000000e+00> : vector<8xf32>
    %146 = vector.multi_reduction <add>, %145, %cst_71 [1] : vector<8x32xf32> to vector<8xf32>
    %147 = vector.shape_cast %146 : vector<8xf32> to vector<8x1xf32>
    %cst_72 = arith.constant 3.200000e+01 : f32
    %148 = vector.broadcast %cst_72 : f32 to vector<8x1xf32>
    %149 = arith.divf %147, %148 : vector<8x1xf32>
    %150 = vector.broadcast %142 : vector<8x1xf32> to vector<8x32xf32>
    %151 = arith.subf %134, %150 : vector<8x32xf32>
    %cst_73 = arith.constant 9.99999974E-6 : f32
    %152 = vector.broadcast %cst_73 : f32 to vector<8x1xf32>
    %153 = arith.addf %149, %152 : vector<8x1xf32>
    %154 = math.rsqrt %153 : vector<8x1xf32>
    %155 = vector.broadcast %154 : vector<8x1xf32> to vector<8x32xf32>
    %156 = arith.mulf %151, %155 : vector<8x32xf32>
    %157 = vector.broadcast %136 : vector<1x32xf32> to vector<8x32xf32>
    %158 = arith.mulf %156, %157 : vector<8x32xf32>
    %159 = vector.broadcast %138 : vector<1x32xf32> to vector<8x32xf32>
    %160 = arith.addf %158, %159 : vector<8x32xf32>
    %c1_74 = arith.constant 1 : index
    %c0_75 = arith.constant 0 : index
    %c0_76 = arith.constant 0 : index
    %161 = vector.load %arg4[%c1_74, %c0_75, %c0_76] : memref<2x32x96xf32, #tpu.memory_space<vmem>>, vector<1x32x96xf32>
    %162 = vector.shape_cast %161 : vector<1x32x96xf32> to vector<32x96xf32>
    %cst_77 = arith.constant dense<0.000000e+00> : vector<8x96xf32>
    %163 = tpu.matmul %160, %162, %cst_77 {dimension_numbers = #tpu.dot_dimension_numbers<[1], [0], [0], [1], [0, 0, 1, 1], [], []>} : vector<8x32xf32>, vector<32x96xf32>, vector<8x96xf32> -> vector<8x96xf32>
    %c1_78 = arith.constant 1 : index
    %c0_79 = arith.constant 0 : index
    %c0_80 = arith.constant 0 : index
    %164 = vector.load %arg5[%c1_78, %c0_79, %c0_80] : memref<2x1x96xf32, #tpu.memory_space<vmem>>, vector<1x1x96xf32>
    %165 = vector.shape_cast %164 : vector<1x1x96xf32> to vector<1x96xf32>
    %166 = vector.broadcast %165 : vector<1x96xf32> to vector<8x96xf32>
    %167 = arith.addf %163, %166 : vector<8x96xf32>
    %168 = vector.extract_strided_slice %167 {offsets = [0, 0], sizes = [8, 32], strides = [1, 1]} : vector<8x96xf32> to vector<8x32xf32>
    %169 = vector.extract_strided_slice %167 {offsets = [0, 32], sizes = [8, 32], strides = [1, 1]} : vector<8x96xf32> to vector<8x32xf32>
    %170 = vector.extract_strided_slice %167 {offsets = [0, 64], sizes = [8, 32], strides = [1, 1]} : vector<8x96xf32> to vector<8x32xf32>
    %171 = vector.extract_strided_slice %168 {offsets = [0, 0], sizes = [8, 8], strides = [1, 1]} : vector<8x32xf32> to vector<8x8xf32>
    %172 = vector.extract_strided_slice %169 {offsets = [0, 0], sizes = [8, 8], strides = [1, 1]} : vector<8x32xf32> to vector<8x8xf32>
    %173 = vector.extract_strided_slice %170 {offsets = [0, 0], sizes = [8, 8], strides = [1, 1]} : vector<8x32xf32> to vector<8x8xf32>
    %174 = tpu.transpose %172, [1, 0] : vector<8x8xf32> -> vector<8x8xf32>
    %cst_81 = arith.constant dense<0.000000e+00> : vector<8x8xf32>
    %175 = tpu.matmul %171, %174, %cst_81 {dimension_numbers = #tpu.dot_dimension_numbers<[1], [0], [0], [1], [0, 0, 1, 1], [], []>} : vector<8x8xf32>, vector<8x8xf32>, vector<8x8xf32> -> vector<8x8xf32>
    %cst_82 = arith.constant dense<0xFF800000> : vector<8xf32>
    %176 = vector.multi_reduction <maximumf>, %175, %cst_82 [1] : vector<8x8xf32> to vector<8xf32>
    %177 = vector.shape_cast %176 : vector<8xf32> to vector<8x1xf32>
    %178 = vector.broadcast %177 : vector<8x1xf32> to vector<8x8xf32>
    %179 = arith.subf %175, %178 : vector<8x8xf32>
    %180 = math.exp %179 : vector<8x8xf32>
    %cst_83 = arith.constant dense<0.000000e+00> : vector<8xf32>
    %181 = vector.multi_reduction <add>, %180, %cst_83 [1] : vector<8x8xf32> to vector<8xf32>
    %182 = vector.shape_cast %181 : vector<8xf32> to vector<8x1xf32>
    %183 = tpu.reciprocal %182 {approx = true} : vector<8x1xf32> -> vector<8x1xf32>
    %184 = vector.broadcast %183 : vector<8x1xf32> to vector<8x8xf32>
    %185 = arith.mulf %180, %184 : vector<8x8xf32>
    %cst_84 = arith.constant dense<0.000000e+00> : vector<8x8xf32>
    %186 = tpu.matmul %185, %173, %cst_84 {dimension_numbers = #tpu.dot_dimension_numbers<[1], [0], [0], [1], [0, 0, 1, 1], [], []>} : vector<8x8xf32>, vector<8x8xf32>, vector<8x8xf32> -> vector<8x8xf32>
    %c0_85 = arith.constant 0 : index
    %c0_86 = arith.constant 0 : index
    %187 = vector.load %arg15[%c0_85, %c0_86] : memref<8x32xf32, #tpu.memory_space<vmem>>, vector<8x8xf32>
    tpu.vector_store %arg15[%c0_85, %c0_86], %186 {strides = array<i32>} : memref<8x32xf32, #tpu.memory_space<vmem>>, vector<8x8xf32>,
    %188 = vector.extract_strided_slice %168 {offsets = [0, 8], sizes = [8, 8], strides = [1, 1]} : vector<8x32xf32> to vector<8x8xf32>
    %189 = vector.extract_strided_slice %169 {offsets = [0, 8], sizes = [8, 8], strides = [1, 1]} : vector<8x32xf32> to vector<8x8xf32>
    %190 = vector.extract_strided_slice %170 {offsets = [0, 8], sizes = [8, 8], strides = [1, 1]} : vector<8x32xf32> to vector<8x8xf32>
    %191 = tpu.transpose %189, [1, 0] : vector<8x8xf32> -> vector<8x8xf32>
    %cst_87 = arith.constant dense<0.000000e+00> : vector<8x8xf32>
    %192 = tpu.matmul %188, %191, %cst_87 {dimension_numbers = #tpu.dot_dimension_numbers<[1], [0], [0], [1], [0, 0, 1, 1], [], []>} : vector<8x8xf32>, vector<8x8xf32>, vector<8x8xf32> -> vector<8x8xf32>
    %cst_88 = arith.constant dense<0xFF800000> : vector<8xf32>
    %193 = vector.multi_reduction <maximumf>, %192, %cst_88 [1] : vector<8x8xf32> to vector<8xf32>
    %194 = vector.shape_cast %193 : vector<8xf32> to vector<8x1xf32>
    %195 = vector.broadcast %194 : vector<8x1xf32> to vector<8x8xf32>
    %196 = arith.subf %192, %195 : vector<8x8xf32>
    %197 = math.exp %196 : vector<8x8xf32>
    %cst_89 = arith.constant dense<0.000000e+00> : vector<8xf32>
    %198 = vector.multi_reduction <add>, %197, %cst_89 [1] : vector<8x8xf32> to vector<8xf32>
    %199 = vector.shape_cast %198 : vector<8xf32> to vector<8x1xf32>
    %200 = tpu.reciprocal %199 {approx = true} : vector<8x1xf32> -> vector<8x1xf32>
    %201 = vector.broadcast %200 : vector<8x1xf32> to vector<8x8xf32>
    %202 = arith.mulf %197, %201 : vector<8x8xf32>
    %cst_90 = arith.constant dense<0.000000e+00> : vector<8x8xf32>
    %203 = tpu.matmul %202, %190, %cst_90 {dimension_numbers = #tpu.dot_dimension_numbers<[1], [0], [0], [1], [0, 0, 1, 1], [], []>} : vector<8x8xf32>, vector<8x8xf32>, vector<8x8xf32> -> vector<8x8xf32>
    %c0_91 = arith.constant 0 : index
    %c8_92 = arith.constant 8 : index
    %204 = vector.load %arg15[%c0_91, %c8_92] : memref<8x32xf32, #tpu.memory_space<vmem>>, vector<8x8xf32>
    tpu.vector_store %arg15[%c0_91, %c8_92], %203 {strides = array<i32>} : memref<8x32xf32, #tpu.memory_space<vmem>>, vector<8x8xf32>,
    %205 = vector.extract_strided_slice %168 {offsets = [0, 16], sizes = [8, 8], strides = [1, 1]} : vector<8x32xf32> to vector<8x8xf32>
    %206 = vector.extract_strided_slice %169 {offsets = [0, 16], sizes = [8, 8], strides = [1, 1]} : vector<8x32xf32> to vector<8x8xf32>
    %207 = vector.extract_strided_slice %170 {offsets = [0, 16], sizes = [8, 8], strides = [1, 1]} : vector<8x32xf32> to vector<8x8xf32>
    %208 = tpu.transpose %206, [1, 0] : vector<8x8xf32> -> vector<8x8xf32>
    %cst_93 = arith.constant dense<0.000000e+00> : vector<8x8xf32>
    %209 = tpu.matmul %205, %208, %cst_93 {dimension_numbers = #tpu.dot_dimension_numbers<[1], [0], [0], [1], [0, 0, 1, 1], [], []>} : vector<8x8xf32>, vector<8x8xf32>, vector<8x8xf32> -> vector<8x8xf32>
    %cst_94 = arith.constant dense<0xFF800000> : vector<8xf32>
    %210 = vector.multi_reduction <maximumf>, %209, %cst_94 [1] : vector<8x8xf32> to vector<8xf32>
    %211 = vector.shape_cast %210 : vector<8xf32> to vector<8x1xf32>
    %212 = vector.broadcast %211 : vector<8x1xf32> to vector<8x8xf32>
    %213 = arith.subf %209, %212 : vector<8x8xf32>
    %214 = math.exp %213 : vector<8x8xf32>
    %cst_95 = arith.constant dense<0.000000e+00> : vector<8xf32>
    %215 = vector.multi_reduction <add>, %214, %cst_95 [1] : vector<8x8xf32> to vector<8xf32>
    %216 = vector.shape_cast %215 : vector<8xf32> to vector<8x1xf32>
    %217 = tpu.reciprocal %216 {approx = true} : vector<8x1xf32> -> vector<8x1xf32>
    %218 = vector.broadcast %217 : vector<8x1xf32> to vector<8x8xf32>
    %219 = arith.mulf %214, %218 : vector<8x8xf32>
    %cst_96 = arith.constant dense<0.000000e+00> : vector<8x8xf32>
    %220 = tpu.matmul %219, %207, %cst_96 {dimension_numbers = #tpu.dot_dimension_numbers<[1], [0], [0], [1], [0, 0, 1, 1], [], []>} : vector<8x8xf32>, vector<8x8xf32>, vector<8x8xf32> -> vector<8x8xf32>
    %c0_97 = arith.constant 0 : index
    %c16_98 = arith.constant 16 : index
    %221 = vector.load %arg15[%c0_97, %c16_98] : memref<8x32xf32, #tpu.memory_space<vmem>>, vector<8x8xf32>
    tpu.vector_store %arg15[%c0_97, %c16_98], %220 {strides = array<i32>} : memref<8x32xf32, #tpu.memory_space<vmem>>, vector<8x8xf32>,
    %222 = vector.extract_strided_slice %168 {offsets = [0, 24], sizes = [8, 8], strides = [1, 1]} : vector<8x32xf32> to vector<8x8xf32>
    %223 = vector.extract_strided_slice %169 {offsets = [0, 24], sizes = [8, 8], strides = [1, 1]} : vector<8x32xf32> to vector<8x8xf32>
    %224 = vector.extract_strided_slice %170 {offsets = [0, 24], sizes = [8, 8], strides = [1, 1]} : vector<8x32xf32> to vector<8x8xf32>
    %225 = tpu.transpose %223, [1, 0] : vector<8x8xf32> -> vector<8x8xf32>
    %cst_99 = arith.constant dense<0.000000e+00> : vector<8x8xf32>
    %226 = tpu.matmul %222, %225, %cst_99 {dimension_numbers = #tpu.dot_dimension_numbers<[1], [0], [0], [1], [0, 0, 1, 1], [], []>} : vector<8x8xf32>, vector<8x8xf32>, vector<8x8xf32> -> vector<8x8xf32>
    %cst_100 = arith.constant dense<0xFF800000> : vector<8xf32>
    %227 = vector.multi_reduction <maximumf>, %226, %cst_100 [1] : vector<8x8xf32> to vector<8xf32>
    %228 = vector.shape_cast %227 : vector<8xf32> to vector<8x1xf32>
    %229 = vector.broadcast %228 : vector<8x1xf32> to vector<8x8xf32>
    %230 = arith.subf %226, %229 : vector<8x8xf32>
    %231 = math.exp %230 : vector<8x8xf32>
    %cst_101 = arith.constant dense<0.000000e+00> : vector<8xf32>
    %232 = vector.multi_reduction <add>, %231, %cst_101 [1] : vector<8x8xf32> to vector<8xf32>
    %233 = vector.shape_cast %232 : vector<8xf32> to vector<8x1xf32>
    %234 = tpu.reciprocal %233 {approx = true} : vector<8x1xf32> -> vector<8x1xf32>
    %235 = vector.broadcast %234 : vector<8x1xf32> to vector<8x8xf32>
    %236 = arith.mulf %231, %235 : vector<8x8xf32>
    %cst_102 = arith.constant dense<0.000000e+00> : vector<8x8xf32>
    %237 = tpu.matmul %236, %224, %cst_102 {dimension_numbers = #tpu.dot_dimension_numbers<[1], [0], [0], [1], [0, 0, 1, 1], [], []>} : vector<8x8xf32>, vector<8x8xf32>, vector<8x8xf32> -> vector<8x8xf32>
    %c0_103 = arith.constant 0 : index
    %c24_104 = arith.constant 24 : index
    %238 = vector.load %arg15[%c0_103, %c24_104] : memref<8x32xf32, #tpu.memory_space<vmem>>, vector<8x8xf32>
    tpu.vector_store %arg15[%c0_103, %c24_104], %237 {strides = array<i32>} : memref<8x32xf32, #tpu.memory_space<vmem>>, vector<8x8xf32>,
    %c0_105 = arith.constant 0 : index
    %c0_106 = arith.constant 0 : index
    %239 = vector.load %arg15[%c0_105, %c0_106] : memref<8x32xf32, #tpu.memory_space<vmem>>, vector<8x32xf32>
    %c1_107 = arith.constant 1 : index
    %c0_108 = arith.constant 0 : index
    %c0_109 = arith.constant 0 : index
    %240 = vector.load %arg6[%c1_107, %c0_108, %c0_109] : memref<2x32x32xf32, #tpu.memory_space<vmem>>, vector<1x32x32xf32>
    %241 = vector.shape_cast %240 : vector<1x32x32xf32> to vector<32x32xf32>
    %cst_110 = arith.constant dense<0.000000e+00> : vector<8x32xf32>
    %242 = tpu.matmul %239, %241, %cst_110 {dimension_numbers = #tpu.dot_dimension_numbers<[1], [0], [0], [1], [0, 0, 1, 1], [], []>} : vector<8x32xf32>, vector<32x32xf32>, vector<8x32xf32> -> vector<8x32xf32>
    %c1_111 = arith.constant 1 : index
    %c0_112 = arith.constant 0 : index
    %c0_113 = arith.constant 0 : index
    %243 = vector.load %arg7[%c1_111, %c0_112, %c0_113] : memref<2x1x32xf32, #tpu.memory_space<vmem>>, vector<1x1x32xf32>
    %244 = vector.shape_cast %243 : vector<1x1x32xf32> to vector<1x32xf32>
    %245 = vector.broadcast %244 : vector<1x32xf32> to vector<8x32xf32>
    %246 = arith.addf %242, %245 : vector<8x32xf32>
    %247 = arith.addf %134, %246 : vector<8x32xf32>
    %c1_114 = arith.constant 1 : index
    %c0_115 = arith.constant 0 : index
    %c0_116 = arith.constant 0 : index
    %248 = vector.load %arg8[%c1_114, %c0_115, %c0_116] : memref<2x1x32xf32, #tpu.memory_space<vmem>>, vector<1x1x32xf32>
    %249 = vector.shape_cast %248 : vector<1x1x32xf32> to vector<1x32xf32>
    %c1_117 = arith.constant 1 : index
    %c0_118 = arith.constant 0 : index
    %c0_119 = arith.constant 0 : index
    %250 = vector.load %arg9[%c1_117, %c0_118, %c0_119] : memref<2x1x32xf32, #tpu.memory_space<vmem>>, vector<1x1x32xf32>
    %251 = vector.shape_cast %250 : vector<1x1x32xf32> to vector<1x32xf32>
    %cst_120 = arith.constant dense<0.000000e+00> : vector<8xf32>
    %252 = vector.multi_reduction <add>, %247, %cst_120 [1] : vector<8x32xf32> to vector<8xf32>
    %253 = vector.shape_cast %252 : vector<8xf32> to vector<8x1xf32>
    %cst_121 = arith.constant 3.200000e+01 : f32
    %254 = vector.broadcast %cst_121 : f32 to vector<8x1xf32>
    %255 = arith.divf %253, %254 : vector<8x1xf32>
    %256 = vector.broadcast %255 : vector<8x1xf32> to vector<8x32xf32>
    %257 = arith.subf %247, %256 : vector<8x32xf32>
    %258 = arith.mulf %257, %257 : vector<8x32xf32>
    %cst_122 = arith.constant dense<0.000000e+00> : vector<8xf32>
    %259 = vector.multi_reduction <add>, %258, %cst_122 [1] : vector<8x32xf32> to vector<8xf32>
    %260 = vector.shape_cast %259 : vector<8xf32> to vector<8x1xf32>
    %cst_123 = arith.constant 3.200000e+01 : f32
    %261 = vector.broadcast %cst_123 : f32 to vector<8x1xf32>
    %262 = arith.divf %260, %261 : vector<8x1xf32>
    %263 = vector.broadcast %255 : vector<8x1xf32> to vector<8x32xf32>
    %264 = arith.subf %247, %263 : vector<8x32xf32>
    %cst_124 = arith.constant 9.99999974E-6 : f32
    %265 = vector.broadcast %cst_124 : f32 to vector<8x1xf32>
    %266 = arith.addf %262, %265 : vector<8x1xf32>
    %267 = math.rsqrt %266 : vector<8x1xf32>
    %268 = vector.broadcast %267 : vector<8x1xf32> to vector<8x32xf32>
    %269 = arith.mulf %264, %268 : vector<8x32xf32>
    %270 = vector.broadcast %249 : vector<1x32xf32> to vector<8x32xf32>
    %271 = arith.mulf %269, %270 : vector<8x32xf32>
    %272 = vector.broadcast %251 : vector<1x32xf32> to vector<8x32xf32>
    %273 = arith.addf %271, %272 : vector<8x32xf32>
    %c1_125 = arith.constant 1 : index
    %c0_126 = arith.constant 0 : index
    %c0_127 = arith.constant 0 : index
    %274 = vector.load %arg10[%c1_125, %c0_126, %c0_127] : memref<2x32x128xf32, #tpu.memory_space<vmem>>, vector<1x32x128xf32>
    %275 = vector.shape_cast %274 : vector<1x32x128xf32> to vector<32x128xf32>
    %cst_128 = arith.constant dense<0.000000e+00> : vector<8x128xf32>
    %276 = tpu.matmul %273, %275, %cst_128 {dimension_numbers = #tpu.dot_dimension_numbers<[1], [0], [0], [1], [0, 0, 1, 1], [], []>} : vector<8x32xf32>, vector<32x128xf32>, vector<8x128xf32> -> vector<8x128xf32>
    %c1_129 = arith.constant 1 : index
    %c0_130 = arith.constant 0 : index
    %c0_131 = arith.constant 0 : index
    %277 = vector.load %arg11[%c1_129, %c0_130, %c0_131] : memref<2x1x128xf32, #tpu.memory_space<vmem>>, vector<1x1x128xf32>
    %278 = vector.shape_cast %277 : vector<1x1x128xf32> to vector<1x128xf32>
    %279 = vector.broadcast %278 : vector<1x128xf32> to vector<8x128xf32>
    %280 = arith.addf %276, %279 : vector<8x128xf32>
    %281 = vector.extract_strided_slice %280 {offsets = [0, 0], sizes = [8, 64], strides = [1, 1]} : vector<8x128xf32> to vector<8x64xf32>
    %282 = vector.extract_strided_slice %280 {offsets = [0, 64], sizes = [8, 64], strides = [1, 1]} : vector<8x128xf32> to vector<8x64xf32>
    %cst_132 = arith.constant 0.000000e+00 : f32
    %283 = vector.broadcast %cst_132 : f32 to vector<8x64xf32>
    %284 = arith.maximumf %282, %283 : vector<8x64xf32>
    %285 = arith.mulf %281, %284 : vector<8x64xf32>
    %c1_133 = arith.constant 1 : index
    %c0_134 = arith.constant 0 : index
    %c0_135 = arith.constant 0 : index
    %286 = vector.load %arg12[%c1_133, %c0_134, %c0_135] : memref<2x64x32xf32, #tpu.memory_space<vmem>>, vector<1x64x32xf32>
    %287 = vector.shape_cast %286 : vector<1x64x32xf32> to vector<64x32xf32>
    %cst_136 = arith.constant dense<0.000000e+00> : vector<8x32xf32>
    %288 = tpu.matmul %285, %287, %cst_136 {dimension_numbers = #tpu.dot_dimension_numbers<[1], [0], [0], [1], [0, 0, 1, 1], [], []>} : vector<8x64xf32>, vector<64x32xf32>, vector<8x32xf32> -> vector<8x32xf32>
    %c1_137 = arith.constant 1 : index
    %c0_138 = arith.constant 0 : index
    %c0_139 = arith.constant 0 : index
    %289 = vector.load %arg13[%c1_137, %c0_138, %c0_139] : memref<2x1x32xf32, #tpu.memory_space<vmem>>, vector<1x1x32xf32>
    %290 = vector.shape_cast %289 : vector<1x1x32xf32> to vector<1x32xf32>
    %291 = vector.broadcast %290 : vector<1x32xf32> to vector<8x32xf32>
    %292 = arith.addf %288, %291 : vector<8x32xf32>
    %293 = arith.addf %247, %292 : vector<8x32xf32>
    %c0_140 = arith.constant 0 : index
    %c0_141 = arith.constant 0 : index
    %c0_142 = arith.constant 0 : index
    %294 = vector.load %arg14[%c0_140, %c0_141, %c0_142] : memref<1x8x32xf32, #tpu.memory_space<vmem>>, vector<1x8x32xf32>
    %295 = vector.shape_cast %294 : vector<1x8x32xf32> to vector<8x32xf32>
    %296 = vector.shape_cast %293 : vector<8x32xf32> to vector<1x8x32xf32>
    tpu.vector_store %arg14[%c0_140, %c0_141, %c0_142], %296 {strides = array<i32>} : memref<1x8x32xf32, #tpu.memory_space<vmem>>, vector<1x8x32xf32>,
    return
  }
  func.func @transform_0(%arg0: i32) -> (i32, i32, i32) {
    %c0_i32 = arith.constant 0 : i32
    %c0_i32_0 = arith.constant 0 : i32
    %c0_i32_1 = arith.constant 0 : i32
    return %arg0, %c0_i32, %c0_i32_0 : i32, i32, i32
  }
  func.func @transform_1(%arg0: i32) -> (i32, i32, i32) {
    %c0_i32 = arith.constant 0 : i32
    %c0_i32_0 = arith.constant 0 : i32
    %c0_i32_1 = arith.constant 0 : i32
    %c0_i32_2 = arith.constant 0 : i32
    return %c0_i32, %c0_i32_0, %c0_i32_1 : i32, i32, i32
  }
  func.func @transform_2(%arg0: i32) -> (i32, i32, i32) {
    %c0_i32 = arith.constant 0 : i32
    %c0_i32_0 = arith.constant 0 : i32
    %c0_i32_1 = arith.constant 0 : i32
    %c0_i32_2 = arith.constant 0 : i32
    return %c0_i32, %c0_i32_0, %c0_i32_1 : i32, i32, i32
  }
  func.func @transform_3(%arg0: i32) -> (i32, i32, i32) {
    %c0_i32 = arith.constant 0 : i32
    %c0_i32_0 = arith.constant 0 : i32
    %c0_i32_1 = arith.constant 0 : i32
    %c0_i32_2 = arith.constant 0 : i32
    return %c0_i32, %c0_i32_0, %c0_i32_1 : i32, i32, i32
  }
  func.func @transform_4(%arg0: i32) -> (i32, i32, i32) {
    %c0_i32 = arith.constant 0 : i32
    %c0_i32_0 = arith.constant 0 : i32
    %c0_i32_1 = arith.constant 0 : i32
    %c0_i32_2 = arith.constant 0 : i32
    return %c0_i32, %c0_i32_0, %c0_i32_1 : i32, i32, i32
  }
  func.func @transform_5(%arg0: i32) -> (i32, i32, i32) {
    %c0_i32 = arith.constant 0 : i32
    %c0_i32_0 = arith.constant 0 : i32
    %c0_i32_1 = arith.constant 0 : i32
    %c0_i32_2 = arith.constant 0 : i32
    return %c0_i32, %c0_i32_0, %c0_i32_1 : i32, i32, i32
  }
  func.func @transform_6(%arg0: i32) -> (i32, i32, i32) {
    %c0_i32 = arith.constant 0 : i32
    %c0_i32_0 = arith.constant 0 : i32
    %c0_i32_1 = arith.constant 0 : i32
    %c0_i32_2 = arith.constant 0 : i32
    return %c0_i32, %c0_i32_0, %c0_i32_1 : i32, i32, i32
  }
  func.func @transform_7(%arg0: i32) -> (i32, i32, i32) {
    %c0_i32 = arith.constant 0 : i32
    %c0_i32_0 = arith.constant 0 : i32
    %c0_i32_1 = arith.constant 0 : i32
    %c0_i32_2 = arith.constant 0 : i32
    return %c0_i32, %c0_i32_0, %c0_i32_1 : i32, i32, i32
  }
  func.func @transform_8(%arg0: i32) -> (i32, i32, i32) {
    %c0_i32 = arith.constant 0 : i32
    %c0_i32_0 = arith.constant 0 : i32
    %c0_i32_1 = arith.constant 0 : i32
    %c0_i32_2 = arith.constant 0 : i32
    return %c0_i32, %c0_i32_0, %c0_i32_1 : i32, i32, i32
  }
  func.func @transform_9(%arg0: i32) -> (i32, i32, i32) {
    %c0_i32 = arith.constant 0 : i32
    %c0_i32_0 = arith.constant 0 : i32
    %c0_i32_1 = arith.constant 0 : i32
    %c0_i32_2 = arith.constant 0 : i32
    return %c0_i32, %c0_i32_0, %c0_i32_1 : i32, i32, i32
  }
  func.func @transform_10(%arg0: i32) -> (i32, i32, i32) {
    %c0_i32 = arith.constant 0 : i32
    %c0_i32_0 = arith.constant 0 : i32
    %c0_i32_1 = arith.constant 0 : i32
    %c0_i32_2 = arith.constant 0 : i32
    return %c0_i32, %c0_i32_0, %c0_i32_1 : i32, i32, i32
  }
  func.func @transform_11(%arg0: i32) -> (i32, i32, i32) {
    %c0_i32 = arith.constant 0 : i32
    %c0_i32_0 = arith.constant 0 : i32
    %c0_i32_1 = arith.constant 0 : i32
    %c0_i32_2 = arith.constant 0 : i32
    return %c0_i32, %c0_i32_0, %c0_i32_1 : i32, i32, i32
  }
  func.func @transform_12(%arg0: i32) -> (i32, i32, i32) {
    %c0_i32 = arith.constant 0 : i32
    %c0_i32_0 = arith.constant 0 : i32
    %c0_i32_1 = arith.constant 0 : i32
    %c0_i32_2 = arith.constant 0 : i32
    return %c0_i32, %c0_i32_0, %c0_i32_1 : i32, i32, i32
  }
  func.func @transform_13(%arg0: i32) -> (i32, i32, i32) {
    %c0_i32 = arith.constant 0 : i32
    %c0_i32_0 = arith.constant 0 : i32
    %c0_i32_1 = arith.constant 0 : i32
    return %arg0, %c0_i32, %c0_i32_0 : i32, i32, i32
  }
}

</mosaic_0001>

<bundles_post_ra>
// kernel: tpu_custom_call.1
= control target key start
LH: loop header
LB: loop body
LE: loop exit
PB: predicated region body
PF: predicated region fallthrough
CT: control target
= control target key end

     0   :  { %s2609_s0 = inlined_call_operand.hbm [shape: f32[2,8,32], index: 0, kind: input, shape index: {}]   ;;  %s2610_s1 = inlined_call_operand.hbm [shape: f32[2,1,32], index: 1, kind: input, shape index: {}]   ;;  %s2611_s2 = inlined_call_operand.hbm [shape: f32[2,1,32], index: 2, kind: input, shape index: {}]   ;;  %s2612_s3 = inlined_call_operand.vmem [shape: f32[2,32,96], index: 3, kind: input, shape index: {}]   ;;  %s2613_s4 = inlined_call_operand.vmem [shape: f32[2,1,96], index: 4, kind: input, shape index: {}]   ;;  %s2614_s5 = inlined_call_operand.vmem [shape: f32[2,32,32], index: 5, kind: input, shape index: {}]   ;;  %s2615_s6 = inlined_call_operand.vmem [shape: f32[2,1,32], index: 6, kind: input, shape index: {}]   ;;  %s2616_s7 = inlined_call_operand.hbm [shape: f32[2,1,32], index: 7, kind: input, shape index: {}]   ;;  %s2617_s8 = inlined_call_operand.hbm [shape: f32[2,1,32], index: 8, kind: input, shape index: {}]   ;;  %s2618_s9 = inlined_call_operand.vmem [shape: f32[2,32,128], index: 9, kind: input, shape index: {}]   ;;  %s2619_s10 = inlined_call_operand.vmem [shape: f32[2,1,128], index: 10, kind: input, shape index: {}]   ;;  %s2620_s11 = inlined_call_operand.vmem [shape: f32[2,64,32], index: 11, kind: input, shape index: {}]   ;;  %s2621_s12 = inlined_call_operand.vmem [shape: f32[2,1,32], index: 12, kind: input, shape index: {}]   ;;  %s2622_s13 = inlined_call_operand.hbm [shape: f32[2,8,32], index: 13, kind: output, shape index: {}]  }
   0x1   :  { %2637 = sst [smem:[#allocation21_spill]] %s2610_s1 }
   0x2   :  { %2638 = sst [smem:[#allocation22_spill]] %s2611_s2 }
   0x3   :  { %2639 = sst [smem:[#allocation23_spill]] %s2616_s7 }
   0x4   :  { %2640 = sst [smem:[#allocation24_spill]] %s2617_s8 }
   0x5   :  { %18 = vsyncpa [#allocation4], 0 }
   0x6   :  { %20 = vsyncpa [#allocation4 + $0x1], 0 }
   0x7   :  { %21 = vsyncpa [#allocation7], 0 }
   0x8   :  { %22 = vsyncpa [#allocation10], 0 }
   0x9   :  { %23 = vsyncpa [#allocation5], 0 }
   0xa   :  { %25 = vsyncpa [#allocation5 + $0x1], 0  ;;  %s2146_s25 = smov 0   ;;  %s2148_s26 = smov 0  }
   0xb   :  { %s2150_s27 = smov 0   ;;  %s2152_s28 = smov 0  }
   0xc LB: > { %2641 = sst [smem:[#allocation17_spill]] %s2049_s27  ;;  %s2170_s15 = sadd.s32 4294967295, %s2053_s28   ;;  %s2053_s28 = sphi %s2152_s28, %s2668_s28   ;;  %s2049_s27 = sphi %s2150_s27, %s2670_s27   ;;  %s2045_s26 = sphi %s2148_s26, %s2672_s26   ;;  %s2041_s25 = sphi %s2146_s25, %s2671_s25  }
   0xd   : > { %s2642_s1 = sld [smem:[#allocation21_spill]]  ;;  %p1596_p0 = scmp.ge.s32.totalorder %s2053_s28, 1 }
   0xe   : > { %p52_p1 = scmp.eq.s32.totalorder %s2170_s15, 0  ;;  %p340_p2 = scmp.lt.s32.totalorder %s2053_s28, 3 }
   0xf   : > { %s2055_s17 = smov [#allocation6]   ;;  %s2644_s7 = sld [smem:[#allocation23_spill]] }
  0x10   : > { %p2175_p3 = pnand %p1596_p0, %p340_p2  ;;  %s353_s18 = sshll.u32 %s2055_s17, 4  ;;  %s354_s18 = int_to_ptr.vmem [resolvable:$true] %s353_s18 }
  0x11   : > { %s2646_s2 = sld [smem:[#allocation22_spill]]  ;;  %s2056_s30 = smov [#allocation9]  }
  0x12   : > { %p1691_p4 = pneg %p2175_p3  ;;  %s393_s17 = sshll.u32 %s2056_s30, 4  ;;  %s394_s17 = int_to_ptr.vmem [resolvable:$true] %s393_s17 }
  0x13   : > { %s351_s14 = sshll.u32 %s2642_s1, 4  ;;  %s2057_s1 = smov 16   ;;  %s352_s14 = int_to_ptr.hbm [resolvable:$true] %s351_s14 }
  0x14   : > { %p2187_p6 = pnand %p1691_p4, %p52_p1  ;;  %s2058_s19 = smov 1  }
  0x15   : > { %s391_s21 = sshll.u32 %s2644_s7, 4  ;;  %s2647_s8 = sld [smem:[#allocation24_spill]]  ;;  %s392_s21 = int_to_ptr.hbm [resolvable:$true] %s391_s21 }
  0x16   : > { %1694 = dma.hbm_to_vmem [thread:$0]  (!%p2187_p6), %s352_s14, 32, %s354_s18, [#allocation7], %s2057_s1, %s2057_s1, %s2058_s19  }
  0x17   : > { %s365_s29 = sshll.u32 %s2646_s2, 4  ;;  %s2059_s24 = smov [#allocation8]   ;;  %s366_s29 = int_to_ptr.hbm [resolvable:$true] %s365_s29 }
  0x18   : > { %1700 = dma.hbm_to_vmem [thread:$0]  (!%p2187_p6), %s392_s21, 32, %s394_s17, [#allocation10], %s2057_s1, %s2057_s1, %s2058_s19  }
  0x19   : > { %s367_s30 = sshll.u32 %s2059_s24, 4  ;;  %s2060_s14 = smov [#allocation11]   ;;  %s368_s30 = int_to_ptr.vmem [resolvable:$true] %s367_s30 }
  0x1a   : > { %1697 = dma.hbm_to_vmem [thread:$0]  (!%p2187_p6), %s366_s29, 32, %s368_s30, [#allocation7], %s2057_s1, %s2057_s1, %s2058_s19  }
  0x1b   : > { %s405_s23 = sshll.u32 %s2647_s8, 4  ;;  %s407_s18 = sshll.u32 %s2060_s14, 4  ;;  %s406_s23 = int_to_ptr.hbm [resolvable:$true] %s405_s23  ;;  %s408_s18 = int_to_ptr.vmem [resolvable:$true] %s407_s18 }
  0x1c   : > { %1703 = dma.hbm_to_vmem [thread:$0]  (!%p2187_p6), %s406_s23, 32, %s408_s18, [#allocation10], %s2057_s1, %s2057_s1, %s2058_s19  }
  0x1d   : > { %s1595_s7 = sadd.s32 4294967294, %s2053_s28   ;;  %s2207_s21 = sadd.s32 1, %s2053_s28  }
  0x1e   : > { %2648 = sst [smem:[#allocation18_spill]] %s2207_s21  ;;  %s35_s17 = ssub.s32 %s2053_s28, %s2207_s21 }
  0x1f   : > { %s38_s20 = sadd.s32 1, %s2049_s27  ;;  %p36_p7 = scmp.eq.s32.totalorder %s35_s17, 0 }
  0x20   : > { %p45_p8 = scmp.ne.s32.totalorder %s2049_s27, %s2045_s26  ;;  %p46_p9 = scmp.eq.s32.totalorder %s2053_s28, 0 }
  0x21   : > { %p51_p10 = scmp.ne.s32.totalorder %s2045_s26, %s2041_s25  ;;  %p327_p13 = scmp.eq.s32.totalorder %s2170_s15, 1 }
  0x22   : > { %s2218_s29 = scalar_select %p36_p7, %s2049_s27, %s38_s20  }
  0x23   : > { %p2220_p11 = por %p46_p9, %p45_p8  ;;  %p2226_p12 = por %p52_p1, %p51_p10 }
  0x24   : > { %2649 = sst [smem:[#allocation19_spill]] %s2218_s29  ;;  %p333_p0 = scmp.eq.s32.totalorder %s1595_s7, 1 }
  0x25   : > { %p1716_p2 = scmp.lt.s32.totalorder %s2053_s28, 2  ;;  %s433_s22 = sand.u32 1, %s2049_s27  }
  0x26   : > { %p2233_p4 = por %p327_p13, %p45_p8  ;;  %p2237_p6 = por %p333_p0, %p51_p10 }
  0x27   : > { %s1602_s30 = sshll.u32 %s433_s22, 3  ;;  %s1603_s14 = sshll.u32 %s2053_s28, 3 }
  0x28   : > { %s2653_s23 = scalar_select %p2237_p6, 1, 0 }
  0x29   : > { %s441_s20 = scalar_lea.hbm %s2609_s0, %s1603_s14  ;;  %s437_s2 = scalar_lea.vmem [#allocation3], %s1602_s30 }
  0x2a   : > { %2654 = sst [smem:[#allocation20_spill]] %s2653_s23  ;;  %s445_s8 = sshll.u32 %s437_s2, 4  ;;  %s446_s8 = int_to_ptr.vmem [resolvable:$true] %s445_s8 }
  0x2b   : > { %s443_s29 = sshll.u32 %s441_s20, 4  ;;  %p2247_p7 = pnand %p1716_p2, %p2220_p11  ;;  %s444_s29 = int_to_ptr.hbm [resolvable:$true] %s443_s29 }
  0x2c   : > { %s434_s27 = scalar_lea.sflag [#allocation4], %s433_s22  ;;  %s1949_s21 = sshra.s32 %s444_s29, 4  ;;  %s1950_s21 = int_to_ptr.hbm [resolvable:$true] %s1949_s21 }
  0x2d   : > { %s1951_s23 = scalar_lea.hbm %s1950_s21, 8  ;;  %p1953_p9 = pneg %p2247_p7 }
  0x2e   : > { %p1952_p8 = scmp.ne.s32.totalorder %s1950_s21, %s1951_s23  ;;  %s1956_s14 = scalar_lea.hbm %s2609_s0, 16 }
  0x2f   : > { %p1957_p11 = scmp.lt.s32.totalorder %s1950_s21, %s2609_s0  ;;  %p1958_p0 = scmp.lt.s32.totalorder %s1956_s14, %s1951_s23 }
  0x30   : > { %p1954_p10 = pnand %p1953_p9, %p1952_p8 }
  0x31   : > { %p1959_p2 = por %p1958_p0, %p1957_p11 }
  0x32   : > { %p1955_p13 = pneg %p1954_p10 }
  0x34   : > { %p1960_p5 = pnand %p1959_p2, %p1955_p13 }
  0x36   : > { %1963 = shalt.err (!%p1960_p5)
}
  0x37   : > { %1707 = dma.hbm_to_vmem [thread:$0]  (!%p2247_p7), %s444_s29, 128, %s446_s8, %s434_s27  }
  0x38   : > { %454 = sbr.rel (%p2175_p3) target bundleno = 4450 (0x1162), region = 72  ;;  %s2264_s22 = sand.u32 (!%p2175_p3), 1, %s2045_s26  }
  0x39   : > { %s2627_s17 = sshll.u32 (!%p2175_p3), %s2264_s22, 3  ;;  %s457_s20 = scalar_lea.sflag (!%p2175_p3), [#allocation4], %s2264_s22 }
  0x3a   : > { %s460_s21 = scalar_lea.vmem (!%p2175_p3), [#allocation3], %s2627_s17 }
  0x3d   : > { %2024 = dma.done.wait (%p2226_p12), %s457_s20, 128  }
  0x3e   : > { %2026 = vsyncadd (%p2226_p12), %s457_s20, 4294967168 }
  0x3f   : > { %2028 = dma.done.wait (%p52_p1), [#allocation7], 64  }
  0x40   : > { %2030 = vsyncadd (%p52_p1), [#allocation7], 4294967232 }
  0x41   : > { %2032 = dma.done.wait (%p52_p1), [#allocation10], 64  }
  0x42   : > { %2034 = vsyncadd (%p52_p1), [#allocation10], 4294967232  ;;  %v528_v0 = vld [vmem:[%s2612_s3 + $0x18] sm:$0xff]  ;;  %v527_v1 = vld [vmem:[%s2612_s3 + $0x10] sm:$0xff]  ;;  %vm533_vm0 = vcmask 261120   ;;  %s2636_s18 = smov 88  }
  0x43   : > { %549 = vmatpush.msra.mxu0 %v528_v0  ;;  %v526_v2 = vld [vmem:[%s2612_s3 + $0x8] sm:$0xff]  ;;  %v525_v3 = vld [vmem:[%s2612_s3] sm:$0xff]  ;;  %s2062_s24 = smov 64   ;;  %s2063_s20 = smov 96   ;;  %vm560_vm1 = vcmask 64512   ;;  %v840_v63 = vld [vmem:[%s2614_s5 + $0x18] sm:$0xff] }
  0x44   : > { %v2294_v4 = vld [vmem:[%s460_s21] sm:$0xff]  ;;  %v1775_v5 = vld [vmem:[%s2613_s4] ss:$0 sm:$0xff]  ;;  %s2064_s21 = smov 120   ;;  %s2065_s8 = smov 80   ;;  %vm692_vm2 = vcmask 130112  }
  0x45   : > { %550 = vmatpush.msra.mxu0 %v527_v1  ;;  %s2632_s27 = smov 72   ;;  %s2067_s16 = smov 112   ;;  %v839_v0 = vld [vmem:[%s2614_s5 + $0x10] sm:$0xff]  ;;  %v838_v1 = vld [vmem:[%s2614_s5 + $0x8] sm:$0xff]  ;;  %vm763_vm3 = vcmask 195712   ;;  %vm834_vm4 = vcmask 261312  }
  0x46   : > { %s2631_s29 = smov 104   ;;  %s2629_s1 = smov 40   ;;  %vm957_vm9 = vcmask 523264  }
  0x47   : > { %551 = vmatpush.msra.mxu0 %v526_v2  ;;  %s2630_s23 = smov 56   ;;  %s2628_s7 = smov 48   ;;  %v837_v2 = vld [vmem:[%s2614_s5] sm:$0xff] }
  0x48   : > { %s2633_s30 = smov 8   ;;  %s2634_s2 = smov 24  }
  0x49   : > { %552 = vmatpush.msra.mxu0 %v525_v3  ;;  %s2635_s14 = smov 16  }
  0x4a   : > { %1611 = vmatmul.msk.f32.vlgmr.msra.gmra.mxu0 %vm533_vm0, %v2294_v4 }
  0xc7   : > { %v554_v6 = vpop.f32.mrf.mxu0 }
  0xc8   : > { %v2301_v7 = vadd.f32 %v1775_v5, %v554_v6 }
  0xca   : > { %625 = vrot.lane.b32.xlu2 %v2301_v7, %s2636_s18  ;;  %596 = vrot.lane.b32.xlu1 %v2301_v7, %s2062_s24 }
  0xcb   : > { %558 = vrot.lane.b32.xlu0 %v2301_v7, %s2063_s20 }
  0xd2   : > { %623 = vrot.lane.b32.xlu2 %v2301_v7, %s2064_s21 }
  0xda   : > { %696 = vrot.lane.b32.xlu2 %v2301_v7, %s2065_s8 }
  0xe2   : > { %767 = vrot.lane.b32.xlu2 %v2301_v7, %s2632_s27 }
  0xea   : > { %694 = vrot.lane.b32.xlu2 %v2301_v7, %s2067_s16 }
 0x124   : > { %v626_v8 = vpop.permute.xlu2 %625 }
 0x12c   : > { %v624_v9 = vpop.permute.xlu2 %623 }
 0x134   : > { %v697_v10 = vpop.permute.xlu2 %696 }
 0x13c   : > { %v768_v11 = vpop.permute.xlu2 %767  ;;  %v597_v12 = vpop.permute.xlu1 %596 }
 0x13d   : > { %v559_v13 = vpop.permute.xlu0 %558  ;;  %617 = vmatpush.msra.mxu3 %v597_v12  ;;  %1621 = vmatpush.xpose.msk.msrb.mxu0 %vm560_vm1, %v768_v11 }
 0x13e   : > { %1612 = vmatpush.xpose.msk.msra.mxu1 %vm560_vm1, %v559_v13  ;;  %v2075_v13 = vmov 32.0  }
 0x13f   : > { %1615 = vmatpush.xpose.msk.msrb.mxu3 %vm560_vm1, %v626_v8  ;;  %v1776_v8 = vld [vmem:[%s2615_s6] ss:$0 sm:$0xff] }
 0x141   : > { %1613 = vmatmul.msk.f32.vlgmr.msra.gmra.mxu1 %vm560_vm1, %v2301_v7 }
 0x142   : > { %1618 = vmatpush.xpose.msk.msrb.mxu1 %vm560_vm1, %v697_v10 }
 0x144   : > { %v695_v14 = vpop.permute.xlu2 %694 }
 0x146   : > { %860 = vmatpush.msra.mxu1 %v840_v63 }
 0x148   : > { %861 = vmatpush.msra.mxu1 %v839_v0 }
 0x149   : > { %1619 = vmatmul.msk.f32.vlgmr.msrb.gmra.mxu1 %vm560_vm1, %v695_v14 }
 0x14a   : > { %862 = vmatpush.msra.mxu1 %v838_v1 }
 0x14c   : > { %863 = vmatpush.msra.mxu1 %v837_v2 }
 0x1be   : > { %v582_v15 = vpop.f32.mrf.mxu1 }
 0x1bf   : > { %v585_v16 = vsel %vm560_vm1, %v582_v15, -inf }
 0x1c0   : > { %586 = vmax.xlane.f32.xlu0 %v585_v16 }
 0x1c6   : > { %v719_v22 = vpop.f32.mrf.mxu1 }
 0x1c7   : > { %v722_v23 = vsel %vm560_vm1, %v719_v22, -inf }
 0x233   : > { %v587_v17 = vpop.xlane.xlu0 %586 }
 0x234   : > { %v588_v18 = vsub.f32 %v582_v15, %v587_v17 }
 0x236   : > { %v589_v19 = vmul.f32 1.442695, %v588_v18 }
 0x238   : > { %1789 = vpow2.f32 %v589_v19 }
 0x23e   : > { %v1790_v20 = vpop.eup %1789 }
 0x23f   : > { %v591_v21 = vsel %vm560_vm1, %v1790_v20, 0.0 }
 0x240   : > { %592 = vadd.xlane.f32.xlu1 %v591_v21 }
 0x259   : > { %765 = vrot.lane.b32.xlu1 %v2301_v7, %s2631_s29  ;;  %s2660_s29 = smov 40  }
 0x283   : > { %723 = vmax.xlane.f32.xlu1 %v722_v23 }
 0x29c   : > { %804 = vrot.lane.b32.xlu1 %v2301_v7, %s2629_s1  ;;  %s2661_s1 = smov 48  }
 0x2b3   : > { %v593_v24 = vpop.xlane.xlu1 %592 }
 0x2b4   : > { %1791 = vrcp.f32 %v593_v24  ;;  %v911_v24 = vld [vmem:[%s2618_s9 + $0x18] sm:$0xff] }
 0x2ba   : > { %v1792_v25 = vpop.eup %1791 }
 0x2bb   : > { %v595_v26 = vmul.f32 %v1792_v25, %v1790_v20  ;;  %v910_v25 = vld [vmem:[%s2618_s9 + $0x10] sm:$0xff] }
 0x2bd   : > { %1614 = vmatmul.msk.f32.vlgmr.msra.gmra.mxu3 %vm560_vm1, %v595_v26  ;;  %v909_v26 = vld [vmem:[%s2618_s9 + $0x8] sm:$0xff] }
 0x2c5   : > { %1616 = vmatmul.msk.f32.vlgmr.msrb.gmra.mxu3 %vm560_vm1, %v624_v9 }
 0x2cb   : > { %v766_v27 = vpop.permute.xlu1 %765 }
 0x2cc   : > { %1622 = vmatmul.msk.f32.vlgmr.msrb.gmra.mxu0 %vm560_vm1, %v766_v27  ;;  %v908_v27 = vld [vmem:[%s2618_s9] sm:$0xff] }
 0x2f6   : > { %v724_v28 = vpop.xlane.xlu1 %723 }
 0x2f7   : > { %v725_v30 = vsub.f32 %v719_v22, %v724_v28 }
 0x2f9   : > { %v726_v31 = vmul.f32 1.442695, %v725_v30 }
 0x2fb   : > { %1793 = vpow2.f32 %v726_v31 }
 0x301   : > { %v1794_v36 = vpop.eup %1793 }
 0x302   : > { %v728_v37 = vsel %vm560_vm1, %v1794_v36, 0.0 }
 0x30e   : > { %v805_v45 = vpop.permute.xlu1 %804 }
 0x340   : > { %v619_v29 = vpop.f32.mrf.mxu3 }
 0x341   : > { %622 = vst.msk [vmem:[#allocation2] sm:$0xff] %vm560_vm1, %v619_v29 }
 0x348   : > { %v648_v32 = vpop.f32.mrf.mxu3 }
 0x349   : > { %v790_v33 = vpop.f32.mrf.mxu0  ;;  %v651_v34 = vsel %vm560_vm1, %v648_v32, -inf }
 0x34a   : > { %652 = vmax.xlane.f32.xlu2 %v651_v34  ;;  %v793_v35 = vsel %vm560_vm1, %v790_v33, -inf }
 0x34b   : > { %794 = vmax.xlane.f32.xlu0 %v793_v35 }
 0x353   : > { %729 = vadd.xlane.f32.xlu0 %v728_v37  ;;  %v1777_v37 = vld [vmem:[#allocation9] ss:$0 sm:$0xff] }
 0x362   : > { %662 = vrot.lane.b32.xlu2 %v2301_v7, %s2630_s23  ;;  %s2662_s23 = smov 8  }
 0x3bd   : > { %v653_v38 = vpop.xlane.xlu2 %652 }
 0x3be   : > { %v795_v39 = vpop.xlane.xlu0 %794  ;;  %v654_v41 = vsub.f32 %v648_v32, %v653_v38 }
 0x3bf   : > { %v796_v40 = vsub.f32 %v790_v33, %v795_v39 }
 0x3c0   : > { %v655_v43 = vmul.f32 1.442695, %v654_v41 }
 0x3c1   : > { %v797_v42 = vmul.f32 1.442695, %v796_v40  ;;  %v1778_v40 = vld [vmem:[#allocation11] ss:$0 sm:$0xff] }
 0x3c3   : > { %1795 = vpow2.f32 %v797_v42 }
 0x3c4   : > { %1797 = vpow2.f32 %v655_v43  ;;  %v952_v43 = vld [vmem:[%s2620_s11 + $0x38] sm:$0xff] }
 0x3c5   : > { %v663_v44 = vpop.permute.xlu2 %662  ;;  %969 = vmatpush.msra.mxu0 %v952_v43 }
 0x3c6   : > { %683 = vmatpush.msra.mxu2 %v663_v44  ;;  %v730_v50 = vpop.xlane.xlu0 %729  ;;  %v951_v44 = vld [vmem:[%s2620_s11 + $0x30] sm:$0xff] }
 0x3c7   : > { %970 = vmatpush.msra.mxu0 %v951_v44 }
 0x3c8   : > { %825 = vmatpush.msrb.mxu2 %v805_v45  ;;  %v950_v45 = vld [vmem:[%s2620_s11 + $0x28] sm:$0xff] }
 0x3c9   : > { %v1796_v46 = vpop.eup %1795  ;;  %971 = vmatpush.msra.mxu0 %v950_v45 }
 0x3ca   : > { %v799_v47 = vsel %vm560_vm1, %v1796_v46, 0.0  ;;  %v1798_v48 = vpop.eup %1797 }
 0x3cb   : > { %800 = vadd.xlane.f32.xlu0 %v799_v47  ;;  %v657_v49 = vsel %vm560_vm1, %v1798_v48, 0.0  ;;  %v948_v47 = vld [vmem:[%s2620_s11 + $0x18] sm:$0xff] }
 0x3d3   : > { %658 = vadd.xlane.f32.xlu0 %v657_v49  ;;  %v946_v49 = vld [vmem:[%s2620_s11 + $0x8] sm:$0xff] }
 0x3e7   : > { %733 = vrot.lane.b32.xlu0 %v2301_v7, %s2628_s7  ;;  %s2663_s7 = smov 24  }
 0x43e   : > { %v801_v51 = vpop.xlane.xlu0 %800 }
 0x446   : > { %v659_v52 = vpop.xlane.xlu0 %658 }
 0x447   : > { %1799 = vrcp.f32 %v659_v52 }
 0x448   : > { %1801 = vrcp.f32 %v801_v51 }
 0x449   : > { %1803 = vrcp.f32 %v730_v50  ;;  %v1779_v50 = vld [vmem:[%s2619_s10] ss:$0 sm:$0xff] }
 0x44a   : > { %1805 = vrcp.f32 %v2075_v13 }
 0x44d   : > { %v1800_v53 = vpop.eup %1799 }
 0x44e   : > { %v661_v54 = vmul.f32 %v1800_v53, %v1798_v48  ;;  %v1802_v55 = vpop.eup %1801  ;;  %v947_v48 = vld [vmem:[%s2620_s11 + $0x10] sm:$0xff] }
 0x44f   : > { %v1804_v56 = vpop.eup %1803  ;;  %v803_v57 = vmul.f32 %v1802_v55, %v1796_v46  ;;  %v949_v46 = vld [vmem:[%s2620_s11 + $0x20] sm:$0xff] }
 0x450   : > { %1617 = vmatmul.msk.f32.vlgmr.msra.gmra.mxu2 %vm560_vm1, %v661_v54  ;;  %v732_v58 = vmul.f32 %v1804_v56, %v1794_v36  ;;  %v1806_v14 = vpop.eup %1805  ;;  %972 = vmatpush.msra.mxu0 %v949_v46  ;;  %v945_v54 = vld [vmem:[%s2620_s11] sm:$0xff] }
 0x451   : > { %v875_v15 = vmul.f32 32.0, %v1806_v14  ;;  %vm879_vm5 = vweird.f32 %v1806_v14 }
 0x452   : > { %973 = vmatpush.msra.mxu0 %v948_v47 }
 0x453   : > { %v876_v16 = vsub.f32 1.0, %v875_v15 }
 0x454   : > { %974 = vmatpush.msra.mxu0 %v947_v48 }
 0x455   : > { %v877_v17 = vmul.f32 %v1806_v14, %v876_v16 }
 0x456   : > { %975 = vmatpush.msra.mxu0 %v946_v49 }
 0x457   : > { %v878_v18 = vadd.f32 %v1806_v14, %v877_v17  ;;  %v1781_v17 = vld [vmem:[#allocation6 + $0x1] ss:$0 sm:$0xff] }
 0x458   : > { %1623 = vmatmul.msk.f32.vlgmr.msrb.gmra.mxu2 %vm560_vm1, %v803_v57  ;;  %976 = vmatpush.msra.mxu0 %v945_v54  ;;  %v1780_v57 = vld [vmem:[%s2621_s12] ss:$0 sm:$0xff] }
 0x459   : > { %v734_v59 = vpop.permute.xlu0 %733  ;;  %v2374_v19 = vsel %vm879_vm5, %v1806_v14, %v878_v18 }
 0x45a   : > { %754 = vmatpush.msra.mxu3 %v734_v59 }
 0x45b   : > { %1620 = vmatmul.msk.f32.vlgmr.msra.gmra.mxu3 %vm560_vm1, %v732_v58 }
 0x45c   : > { %931 = vmatpush.msrb.mxu3 %v911_v24 }
 0x45e   : > { %932 = vmatpush.msrb.mxu3 %v910_v25 }
 0x460   : > { %933 = vmatpush.msrb.mxu3 %v909_v26 }
 0x462   : > { %934 = vmatpush.msrb.mxu3 %v908_v27 }
 0x4d3   : > { %v685_v60 = vpop.f32.mrf.mxu2 }
 0x4d4   : > { %689 = vrot.lane.b32.xlu0 %v685_v60, %s2633_s30  ;;  %s2664_s30 = smov 16  }
 0x4db   : > { %v827_v61 = vpop.f32.mrf.mxu2 }
 0x4dc   : > { %831 = vrot.lane.b32.xlu1 %v827_v61, %s2634_s2 }
 0x4de   : > { %v756_v62 = vpop.f32.mrf.mxu3 }
 0x4df   : > { %760 = vrot.lane.b32.xlu2 %v756_v62, %s2635_s14 }
 0x539   : > { %v761_v5 = vpop.permute.xlu2 %760 }
 0x546   : > { %v690_v3 = vpop.permute.xlu0 %689 }
 0x547   : > { %693 = vst.msk [vmem:[#allocation2] sm:$0xff] %vm692_vm2, %v690_v3  ;;  %v1630_v3 = vld [vmem:[%s2612_s3 + $0x38] sm:$0xff] }
 0x548   : > { %764 = vst.msk [vmem:[#allocation2] sm:$0xff] %vm763_vm3, %v761_v5  ;;  %1041 = vmatpush.msra.mxu2 %v1630_v3  ;;  %v1629_v5 = vld [vmem:[%s2612_s3 + $0x30] sm:$0xff] }
 0x54a   : > { %1042 = vmatpush.msra.mxu2 %v1629_v5 }
 0x54e   : > { %v832_v6 = vpop.permute.xlu1 %831 }
 0x54f   : > { %835 = vst.msk [vmem:[#allocation2] sm:$0xff] %vm834_vm4, %v832_v6  ;;  %v1628_v6 = vld [vmem:[%s2612_s3 + $0x28] sm:$0xff] }
 0x550   : > { %1043 = vmatpush.msra.mxu2 %v1628_v6 }
 0x556   : > { %v836_v7 = vld [vmem:[#allocation2] sm:$0xff] }
 0x557   : > { %1624 = vmatmul.msk.f32.vlgmr.msra.gmra.mxu1 %vm533_vm0, %v836_v7  ;;  %v1627_v7 = vld [vmem:[%s2612_s3 + $0x20] sm:$0xff] }
 0x558   : > { %1044 = vmatpush.msra.mxu2 %v1627_v7 }
 0x5d4   : > { %v865_v9 = vpop.f32.mrf.mxu1 }
 0x5d5   : > { %v866_v10 = vadd.f32 %v1776_v8, %v865_v9 }
 0x5d7   : > { %v2370_v11 = vadd.f32 %v866_v10, %v2294_v4 }
 0x5d9   : > { %v871_v12 = vsel %vm533_vm0, %v2370_v11, 0.0 }
 0x5da   : > { %872 = vadd.xlane.f32.xlu0 %v871_v12 }
 0x64d   : > { %v873_v20 = vpop.xlane.xlu0 %872 }
 0x64e   : > { %v881_v21 = vmul.f32 %v2374_v19, %v873_v20 }
 0x650   : > { %v882_v4 = vsub.f32 %v2370_v11, %v881_v21  ;;  %v1782_v21 = vld [vmem:[#allocation8 + $0x1] ss:$0 sm:$0xff] }
 0x652   : > { %v883_v22 = vmul.f32 %v882_v4, %v882_v4 }
 0x654   : > { %v884_v23 = vsel %vm533_vm0, %v883_v22, 0.0 }
 0x655   : > { %885 = vadd.xlane.f32.xlu2 %v884_v23  ;;  %v1783_v23 = vld [vmem:[%s2613_s4 + $0x1] ss:$0 sm:$0xff] }
 0x6c8   : > { %v886_v28 = vpop.xlane.xlu2 %885 }
 0x6c9   : > { %v887_v29 = vmul.f32 %v886_v28, %v2374_v19 }
 0x6cb   : > { %v888_v30 = vadd.f32 1e-05, %v887_v29 }
 0x6cd   : > { %1807 = vrsqrt.f32 %v888_v30  ;;  %vm895_vm7 = vweird.f32 %v888_v30 }
 0x6d3   : > { %v1808_v31 = vpop.eup %1807 }
 0x6d4   : > { %v890_v32 = vmul.f32 %v1808_v31, %v888_v30  ;;  %vm896_vm6 = vweird.f32 %v1808_v31 }
 0x6d5   : > { %vm897_vm8 = vmor %vm895_vm7, %vm896_vm6 }
 0x6d6   : > { %v891_v33 = vmul.f32 %v1808_v31, %v890_v32 }
 0x6d8   : > { %v892_v34 = vmul.f32 0.5, %v891_v33 }
 0x6da   : > { %v893_v35 = vsub.f32 1.5, %v892_v34 }
 0x6dc   : > { %v894_v36 = vmul.f32 %v1808_v31, %v893_v35 }
 0x6de   : > { %v898_v38 = vsel %vm897_vm8, %v1808_v31, %v894_v36 }
 0x6df   : > { %v899_v39 = vmul.f32 %v898_v38, %v882_v4 }
 0x6e1   : > { %v903_v41 = vmul.f32 %v1777_v37, %v899_v39 }
 0x6e3   : > { %v907_v42 = vadd.f32 %v1778_v40, %v903_v41 }
 0x6e5   : > { %1625 = vmatmul.msk.f32.vlgmr.msrb.gmra.mxu3 %vm533_vm0, %v907_v42 }
 0x768   : > { %v936_v51 = vpop.f32.mrf.mxu3 }
 0x769   : > { %v937_v52 = vadd.f32 %v1779_v50, %v936_v51 }
 0x76b   : > { %v939_v53 = vmax.f32 %v937_v52, 0.0 }
 0x76d   : > { %941 = vrot.lane.b32.xlu1 %v939_v53, %s2062_s24 }
 0x7df   : > { %v942_v55 = vpop.permute.xlu1 %941 }
 0x7e0   : > { %v944_v56 = vmul.f32 %v942_v55, %v937_v52 }
 0x7e2   : > { %1626 = vmatmul.msk.f32.vlgmr.msra.gmra.mxu0 %vm957_vm9, %v944_v56 }
 0x85f   : > { %v978_v58 = vpop.f32.mrf.mxu0 }
 0x860   : > { %v979_v59 = vadd.f32 %v1780_v57, %v978_v58 }
 0x862   : > { %v2426_v60 = vadd.f32 %v979_v59, %v2370_v11 }
 0x864   : > { %v986_v61 = vsel %vm533_vm0, %v2426_v60, 0.0 }
 0x865   : > { %987 = vadd.xlane.f32.xlu1 %v986_v61 }
 0x8d8   : > { %v988_v62 = vpop.xlane.xlu1 %987 }
 0x8d9   : > { %v989_v63 = vmul.f32 %v988_v62, %v2374_v19 }
 0x8db   : > { %v990_v0 = vsub.f32 %v2426_v60, %v989_v63 }
 0x8dd   : > { %v991_v1 = vmul.f32 %v990_v0, %v990_v0 }
 0x8df   : > { %v992_v2 = vsel %vm533_vm0, %v991_v1, 0.0 }
 0x8e0   : > { %993 = vadd.xlane.f32.xlu0 %v992_v2 }
 0x953   : > { %v994_v8 = vpop.xlane.xlu0 %993 }
 0x954   : > { %v995_v9 = vmul.f32 %v994_v8, %v2374_v19 }
 0x956   : > { %v996_v10 = vadd.f32 1e-05, %v995_v9 }
 0x958   : > { %1809 = vrsqrt.f32 %v996_v10  ;;  %vm1003_vm11 = vweird.f32 %v996_v10 }
 0x95e   : > { %v1810_v11 = vpop.eup %1809 }
 0x95f   : > { %v998_v12 = vmul.f32 %v1810_v11, %v996_v10  ;;  %vm1004_vm10 = vweird.f32 %v1810_v11 }
 0x960   : > { %vm1005_vm12 = vmor %vm1003_vm11, %vm1004_vm10 }
 0x961   : > { %v999_v13 = vmul.f32 %v1810_v11, %v998_v12 }
 0x963   : > { %v1000_v14 = vmul.f32 0.5, %v999_v13 }
 0x965   : > { %v1001_v15 = vsub.f32 1.5, %v1000_v14 }
 0x967   : > { %v1002_v16 = vmul.f32 %v1810_v11, %v1001_v15 }
 0x969   : > { %v1006_v18 = vsel %vm1005_vm12, %v1810_v11, %v1002_v16 }
 0x96a   : > { %v1007_v20 = vmul.f32 %v1006_v18, %v990_v0 }
 0x96c   : > { %v1011_v4 = vmul.f32 %v1781_v17, %v1007_v20 }
 0x96e   : > { %v1015_v22 = vadd.f32 %v1782_v21, %v1011_v4  ;;  %v1648_v21 = vld [vmem:[%s2614_s5 + $0x38] sm:$0xff]  ;;  %v1647_v4 = vld [vmem:[%s2614_s5 + $0x30] sm:$0xff] }
 0x970   : > { %1632 = vmatmul.msk.f32.vlgmr.msra.gmra.mxu2 %vm533_vm0, %v1015_v22  ;;  %v1646_v22 = vld [vmem:[%s2614_s5 + $0x28] sm:$0xff] }
 0x9f3   : > { %v1046_v24 = vpop.f32.mrf.mxu2 }
 0x9f4   : > { %v2450_v25 = vadd.f32 %v1783_v23, %v1046_v24  ;;  %v1645_v23 = vld [vmem:[%s2614_s5 + $0x20] sm:$0xff] }
 0x9f6   : > { %1050 = vrot.lane.b32.xlu2 %v2450_v25, %s2063_s20  ;;  %s2656_s20 = smov 88  }
 0x9fe   : > { %1114 = vrot.lane.b32.xlu2 %v2450_v25, %s2064_s21  ;;  %s2657_s21 = smov 72  }
 0xa06   : > { %1186 = vrot.lane.b32.xlu2 %v2450_v25, %s2065_s8  ;;  %s2658_s8 = smov 104  }
 0xa0e   : > { %1184 = vrot.lane.b32.xlu2 %v2450_v25, %s2067_s16  ;;  %s2659_s16 = smov 56  }
 0xa50   : > { %v1051_v26 = vpop.permute.xlu2 %1050 }
 0xa51   : > { %1633 = vmatpush.xpose.msk.msrb.mxu1 %vm560_vm1, %v1051_v26 }
 0xa54   : > { %1634 = vmatmul.msk.f32.vlgmr.msrb.gmra.mxu1 %vm560_vm1, %v2450_v25 }
 0xa58   : > { %v1115_v35 = vpop.permute.xlu2 %1114 }
 0xa60   : > { %v1187_v40 = vpop.permute.xlu2 %1186 }
 0xa68   : > { %v1185_v45 = vpop.permute.xlu2 %1184 }
 0xad1   : > { %v1073_v27 = vpop.f32.mrf.mxu1 }
 0xad2   : > { %v1076_v28 = vsel %vm560_vm1, %v1073_v27, -inf }
 0xad3   : > { %1077 = vmax.xlane.f32.xlu0 %v1076_v28 }
 0xae7   : > { %1116 = vrot.lane.b32.xlu0 %v2450_v25, %s2656_s20 }
 0xaef   : > { %1256 = vrot.lane.b32.xlu0 %v2450_v25, %s2657_s21 }
 0xaf7   : > { %1254 = vrot.lane.b32.xlu0 %v2450_v25, %s2658_s8  ;;  %s1999_s8 = scalar_lea.hbm %s2622_s13, 16 }
 0xb46   : > { %v1078_v29 = vpop.xlane.xlu0 %1077 }
 0xb47   : > { %v1079_v30 = vsub.f32 %v1073_v27, %v1078_v29  ;;  %v1784_v27 = vld [vmem:[%s2615_s6 + $0x1] ss:$0 sm:$0xff] }
 0xb49   : > { %v1080_v31 = vmul.f32 1.442695, %v1079_v30 }
 0xb4b   : > { %1811 = vpow2.f32 %v1080_v31 }
 0xb51   : > { %v1812_v32 = vpop.eup %1811 }
 0xb52   : > { %v1082_v33 = vsel %vm560_vm1, %v1812_v32, 0.0 }
 0xb53   : > { %1083 = vadd.xlane.f32.xlu1 %v1082_v33 }
 0xb59   : > { %v1117_v34 = vpop.permute.xlu0 %1116 }
 0xb5a   : > { %1636 = vmatpush.xpose.msk.msrb.mxu2 %vm560_vm1, %v1117_v34 }
 0xb5d   : > { %1637 = vmatmul.msk.f32.vlgmr.msrb.gmra.mxu2 %vm560_vm1, %v1115_v35 }
 0xb61   : > { %v1257_v36 = vpop.permute.xlu0 %1256 }
 0xb62   : > { %1642 = vmatpush.xpose.msk.msra.mxu2 %vm560_vm1, %v1257_v36 }
 0xb69   : > { %v1255_v37 = vpop.permute.xlu0 %1254 }
 0xb6a   : > { %1643 = vmatmul.msk.f32.vlgmr.msra.gmra.mxu2 %vm560_vm1, %v1255_v37  ;;  %v1654_v37 = vld [vmem:[%s2618_s9 + $0x38] sm:$0xff] }
 0xb6c   : > { %1087 = vrot.lane.b32.xlu1 %v2450_v25, %s2062_s24 }
 0xbc6   : > { %v1084_v38 = vpop.xlane.xlu1 %1083 }
 0xbc7   : > { %1813 = vrcp.f32 %v1084_v38  ;;  %v1652_v38 = vld [vmem:[%s2618_s9 + $0x28] sm:$0xff] }
 0xbcd   : > { %v1814_v39 = vpop.eup %1813 }
 0xbce   : > { %v1086_v41 = vmul.f32 %v1814_v39, %v1812_v32  ;;  %v1651_v39 = vld [vmem:[%s2618_s9 + $0x20] sm:$0xff] }
 0xbde   : > { %v1088_v42 = vpop.permute.xlu1 %1087 }
 0xbdf   : > { %1108 = vmatpush.msra.mxu3 %v1088_v42 }
 0xbe0   : > { %1635 = vmatmul.msk.f32.vlgmr.msra.gmra.mxu3 %vm560_vm1, %v1086_v41  ;;  %v1139_v43 = vpop.f32.mrf.mxu2 }
 0xbe1   : > { %1639 = vmatpush.xpose.msk.msrb.mxu3 %vm560_vm1, %v1187_v40  ;;  %v1142_v44 = vsel %vm560_vm1, %v1139_v43, -inf }
 0xbe2   : > { %1143 = vmax.xlane.f32.xlu1 %v1142_v44 }
 0xbe5   : > { %1350 = vmatpush.msra.mxu3 %v1648_v21 }
 0xbe7   : > { %1351 = vmatpush.msra.mxu3 %v1647_v4 }
 0xbe8   : > { %1640 = vmatmul.msk.f32.vlgmr.msrb.gmra.mxu3 %vm560_vm1, %v1185_v45 }
 0xbe9   : > { %1352 = vmatpush.msra.mxu3 %v1646_v22 }
 0xbeb   : > { %1353 = vmatpush.msra.mxu3 %v1645_v23 }
 0xbed   : > { %v1279_v46 = vpop.f32.mrf.mxu2 }
 0xbee   : > { %v1282_v47 = vsel %vm560_vm1, %v1279_v46, -inf }
 0xbef   : > { %1283 = vmax.xlane.f32.xlu0 %v1282_v47 }
 0xc55   : > { %v1144_v48 = vpop.xlane.xlu1 %1143 }
 0xc56   : > { %v1145_v49 = vsub.f32 %v1139_v43, %v1144_v48 }
 0xc58   : > { %v1146_v50 = vmul.f32 1.442695, %v1145_v49  ;;  %v1785_v49 = vld [vmem:[#allocation9 + $0x1] ss:$0 sm:$0xff] }
 0xc5a   : > { %1815 = vpow2.f32 %v1146_v50 }
 0xc60   : > { %v1816_v51 = vpop.eup %1815 }
 0xc61   : > { %v1148_v52 = vsel %vm560_vm1, %v1816_v51, 0.0 }
 0xc62   : > { %v1284_v53 = vpop.xlane.xlu0 %1283  ;;  %1149 = vadd.xlane.f32.xlu1 %v1148_v52  ;;  %v1786_v52 = vld [vmem:[#allocation11 + $0x1] ss:$0 sm:$0xff] }
 0xc63   : > { %v1285_v54 = vsub.f32 %v1279_v46, %v1284_v53  ;;  %v1110_v55 = vpop.f32.mrf.mxu3 }
 0xc64   : > { %1113 = vst.msk [vmem:[#allocation2] sm:$0xff] %vm560_vm1, %v1110_v55  ;;  %v1663_v55 = vld [vmem:[%s2620_s11 + $0x70] sm:$0xff] }
 0xc65   : > { %v1286_v56 = vmul.f32 1.442695, %v1285_v54 }
 0xc67   : > { %1817 = vpow2.f32 %v1286_v56  ;;  %v1662_v56 = vld [vmem:[%s2620_s11 + $0x68] sm:$0xff] }
 0xc6b   : > { %v1209_v57 = vpop.f32.mrf.mxu3 }
 0xc6c   : > { %v1212_v58 = vsel %vm560_vm1, %v1209_v57, -inf }
 0xc6d   : > { %v1818_v59 = vpop.eup %1817  ;;  %1213 = vmax.xlane.f32.xlu2 %v1212_v58  ;;  %v1660_v58 = vld [vmem:[%s2620_s11 + $0x58] sm:$0xff] }
 0xc6e   : > { %v1288_v61 = vsel %vm560_vm1, %v1818_v59, 0.0 }
 0xc6f   : > { %1289 = vadd.xlane.f32.xlu0 %v1288_v61  ;;  %v1658_v61 = vld [vmem:[%s2620_s11 + $0x48] sm:$0xff] }
 0xc7b   : > { %1153 = vrot.lane.b32.xlu1 %v2450_v25, %s2659_s16  ;;  %s1668_s16 = sshll.u32 %s2170_s15, 3  ;;  %s1472_s15 = scalar_lea.sflag [#allocation5], %s2264_s22 }
 0xc83   : > { %1293 = vrot.lane.b32.xlu0 %v2450_v25, %s2660_s29 }
 0xcd5   : > { %v1150_v63 = vpop.xlane.xlu1 %1149 }
 0xcd6   : > { %1819 = vrcp.f32 %v1150_v63 }
 0xcdc   : > { %v1820_v3 = vpop.eup %1819 }
 0xcdd   : > { %v1152_v7 = vmul.f32 %v1820_v3, %v1816_v51 }
 0xce0   : > { %v1214_v62 = vpop.xlane.xlu2 %1213 }
 0xce1   : > { %v1215_v0 = vsub.f32 %v1209_v57, %v1214_v62  ;;  %v1661_v57 = vld [vmem:[%s2620_s11 + $0x60] sm:$0xff] }
 0xce2   : > { %v1290_v2 = vpop.xlane.xlu0 %1289  ;;  %v1787_v62 = vld [vmem:[%s2619_s10 + $0x1] ss:$0 sm:$0xff] }
 0xce3   : > { %v1216_v1 = vmul.f32 1.442695, %v1215_v0 }
 0xce5   : > { %1821 = vpow2.f32 %v1216_v1 }
 0xce6   : > { %1823 = vrcp.f32 %v1290_v2  ;;  %v1657_v2 = vld [vmem:[%s2620_s11 + $0x40] sm:$0xff] }
 0xceb   : > { %v1822_v5 = vpop.eup %1821 }
 0xcec   : > { %v1218_v6 = vsel %vm560_vm1, %v1822_v5, 0.0  ;;  %v1824_v9 = vpop.eup %1823 }
 0xced   : > { %v1154_v8 = vpop.permute.xlu1 %1153  ;;  %1219 = vadd.xlane.f32.xlu2 %v1218_v6  ;;  %v1292_v10 = vmul.f32 %v1824_v9, %v1818_v59  ;;  %v1659_v59 = vld [vmem:[%s2620_s11 + $0x50] sm:$0xff]  ;;  %v1788_v6 = vld [vmem:[%s2621_s12 + $0x1] ss:$0 sm:$0xff] }
 0xcee   : > { %1174 = vmatpush.msra.mxu1 %v1154_v8 }
 0xcef   : > { %1638 = vmatmul.msk.f32.vlgmr.msra.gmra.mxu1 %vm560_vm1, %v1152_v7 }
 0xcf5   : > { %v1294_v11 = vpop.permute.xlu0 %1293 }
 0xcf6   : > { %1314 = vmatpush.msrb.mxu1 %v1294_v11 }
 0xcf7   : > { %1644 = vmatmul.msk.f32.vlgmr.msrb.gmra.mxu1 %vm560_vm1, %v1292_v10 }
 0xd05   : > { %1223 = vrot.lane.b32.xlu2 %v2450_v25, %s2661_s1 }
 0xd60   : > { %v1220_v12 = vpop.xlane.xlu2 %1219 }
 0xd61   : > { %1825 = vrcp.f32 %v1220_v12 }
 0xd67   : > { %v1826_v13 = vpop.eup %1825 }
 0xd68   : > { %v1222_v14 = vmul.f32 %v1826_v13, %v1822_v5  ;;  %v1224_v15 = vpop.permute.xlu2 %1223 }
 0xd69   : > { %1244 = vmatpush.msrb.mxu0 %v1224_v15 }
 0xd6a   : > { %1641 = vmatmul.msk.f32.vlgmr.msrb.gmra.mxu0 %vm560_vm1, %v1222_v14 }
 0xd6b   : > { %1418 = vmatpush.msra.mxu0 %v1654_v37 }
 0xd6c   : > { %v1176_v16 = vpop.f32.mrf.mxu1 }
 0xd6d   : > { %1180 = vrot.lane.b32.xlu0 %v1176_v16, %s2662_s23 }
 0xd74   : > { %v1316_v17 = vpop.f32.mrf.mxu1 }
 0xd75   : > { %1320 = vrot.lane.b32.xlu2 %v1316_v17, %s2663_s7 }
 0xdcf   : > { %v1321_v25 = vpop.permute.xlu2 %1320 }
 0xddf   : > { %v1181_v18 = vpop.permute.xlu0 %1180 }
 0xde0   : > { %1183 = vst.msk [vmem:[#allocation2] sm:$0xff] %vm692_vm2, %v1181_v18 }
 0xde7   : > { %v1246_v20 = vpop.f32.mrf.mxu0 }
 0xde8   : > { %1250 = vrot.lane.b32.xlu1 %v1246_v20, %s2664_s30  ;;  %s2665_s30 = sshll.u32 %s2264_s22, 3 }
 0xde9   : > { %s523_s2 = scalar_lea.vmem [#allocation12], %s2665_s30 }
 0xdea   : > { %s1484_s18 = sshll.u32 %s523_s2, 4  ;;  %s1485_s18 = int_to_ptr.vmem [resolvable:$true] %s1484_s18 }
 0xe5a   : > { %v1251_v24 = vpop.permute.xlu1 %1250 }
 0xe5b   : > { %1253 = vst.msk [vmem:[#allocation2] sm:$0xff] %vm763_vm3, %v1251_v24 }
 0xe5c   : > { %1323 = vst.msk [vmem:[#allocation2] sm:$0xff] %vm834_vm4, %v1321_v25 }
 0xe63   : > { %v1324_v26 = vld [vmem:[#allocation2] sm:$0xff] }
 0xe64   : > { %1650 = vmatmul.msk.f32.vlgmr.msra.gmra.mxu3 %vm533_vm0, %v1324_v26 }
 0xee7   : > { %v1355_v28 = vpop.f32.mrf.mxu3 }
 0xee8   : > { %v1356_v29 = vadd.f32 %v1784_v27, %v1355_v28 }
 0xeea   : > { %v2519_v30 = vadd.f32 %v1356_v29, %v2426_v60  ;;  %v1653_v60 = vld [vmem:[%s2618_s9 + $0x30] sm:$0xff] }
 0xeeb   : > { %1419 = vmatpush.msra.mxu0 %v1653_v60 }
 0xeec   : > { %v1363_v31 = vsel %vm533_vm0, %v2519_v30, 0.0 }
 0xeed   : > { %1364 = vadd.xlane.f32.xlu0 %v1363_v31  ;;  %1420 = vmatpush.msra.mxu0 %v1652_v38 }
 0xeef   : > { %1421 = vmatpush.msra.mxu0 %v1651_v39 }
 0xf60   : > { %v1365_v32 = vpop.xlane.xlu0 %1364 }
 0xf61   : > { %v1366_v33 = vmul.f32 %v1365_v32, %v2374_v19 }
 0xf63   : > { %v1367_v34 = vsub.f32 %v2519_v30, %v1366_v33 }
 0xf65   : > { %v1368_v35 = vmul.f32 %v1367_v34, %v1367_v34 }
 0xf67   : > { %v1369_v36 = vsel %vm533_vm0, %v1368_v35, 0.0 }
 0xf68   : > { %1370 = vadd.xlane.f32.xlu1 %v1369_v36 }
 0xfdb   : > { %v1371_v40 = vpop.xlane.xlu1 %1370 }
 0xfdc   : > { %v1372_v41 = vmul.f32 %v1371_v40, %v2374_v19  ;;  %v1664_v19 = vld [vmem:[%s2620_s11 + $0x78] sm:$0xff] }
 0xfdd   : > { %1457 = vmatpush.msrb.mxu2 %v1664_v19 }
 0xfde   : > { %v1373_v42 = vadd.f32 1e-05, %v1372_v41 }
 0xfdf   : > { %1458 = vmatpush.msrb.mxu2 %v1663_v55 }
 0xfe0   : > { %1827 = vrsqrt.f32 %v1373_v42  ;;  %vm1380_vm14 = vweird.f32 %v1373_v42 }
 0xfe1   : > { %1459 = vmatpush.msrb.mxu2 %v1662_v56 }
 0xfe3   : > { %1460 = vmatpush.msrb.mxu2 %v1661_v57 }
 0xfe5   : > { %1461 = vmatpush.msrb.mxu2 %v1660_v58 }
 0xfe6   : > { %v1828_v43 = vpop.eup %1827 }
 0xfe7   : > { %v1375_v44 = vmul.f32 %v1828_v43, %v1373_v42  ;;  %vm1381_vm13 = vweird.f32 %v1828_v43  ;;  %1462 = vmatpush.msrb.mxu2 %v1659_v59 }
 0xfe8   : > { %vm1382_vm15 = vmor %vm1380_vm14, %vm1381_vm13 }
 0xfe9   : > { %v1376_v45 = vmul.f32 %v1828_v43, %v1375_v44  ;;  %1463 = vmatpush.msrb.mxu2 %v1658_v61 }
 0xfeb   : > { %v1377_v46 = vmul.f32 0.5, %v1376_v45  ;;  %1464 = vmatpush.msrb.mxu2 %v1657_v2 }
 0xfed   : > { %v1378_v47 = vsub.f32 1.5, %v1377_v46 }
 0xfef   : > { %v1379_v48 = vmul.f32 %v1828_v43, %v1378_v47 }
 0xff1   : > { %v1383_v50 = vsel %vm1382_vm15, %v1828_v43, %v1379_v48 }
 0xff2   : > { %v1384_v51 = vmul.f32 %v1383_v50, %v1367_v34 }
 0xff4   : > { %v1388_v53 = vmul.f32 %v1785_v49, %v1384_v51 }
 0xff6   : > { %v1392_v54 = vadd.f32 %v1786_v52, %v1388_v53 }
 0xff8   : > { %1656 = vmatmul.msk.f32.vlgmr.msra.gmra.mxu0 %vm533_vm0, %v1392_v54 }
0x1075   : > { %v1423_v63 = vpop.f32.mrf.mxu0 }
0x1076   : > { %v1424_v0 = vadd.f32 %v1787_v62, %v1423_v63 }
0x1078   : > { %v1426_v1 = vmax.f32 %v1424_v0, 0.0 }
0x107a   : > { %1428 = vrot.lane.b32.xlu2 %v1426_v1, %s2062_s24  ;;  %s1482_s24 = scalar_lea.hbm %s2622_s13, %s1668_s16 }
0x107b   : > { %s1486_s14 = sshll.u32 %s1482_s24, 4  ;;  %s1487_s14 = int_to_ptr.hbm [resolvable:$true] %s1486_s14 }
0x107c   : > { %s1993_s17 = sshra.s32 %s1487_s14, 4  ;;  %s1994_s17 = int_to_ptr.hbm [resolvable:$true] %s1993_s17 }
0x107d   : > { %s1995_s27 = scalar_lea.hbm %s1994_s17, 8  ;;  %p2000_p12 = scmp.lt.s32.totalorder %s1994_s17, %s2622_s13 }
0x107e   : > { %p1996_p1 = scmp.ne.s32.totalorder %s1994_s17, %s1995_s27  ;;  %p2001_p7 = scmp.lt.s32.totalorder %s1999_s8, %s1995_s27 }
0x1080   : > { %p1997_p3 = pnand %p1996_p1, %p2233_p4  ;;  %p2002_p8 = por %p2001_p7, %p2000_p12 }
0x1082   : > { %p1998_p5 = pneg %p1997_p3 }
0x1084   : > { %p2003_p9 = pnand %p2002_p8, %p1998_p5 }
0x10d4   : > { %v1429_v3 = vpop.permute.xlu2 %1428 }
0x10d5   : > { %v1431_v5 = vmul.f32 %v1429_v3, %v1424_v0 }
0x10d7   : > { %1666 = vmatmul.msk.f32.vlgmr.msrb.gmra.mxu2 %vm957_vm9, %v1431_v5 }
0x115a   : > { %v1466_v7 = vpop.f32.mrf.mxu2 }
0x115b   : > { %v1467_v8 = vadd.f32 %v1788_v6, %v1466_v7 }
0x115d   : > { %v1469_v9 = vadd.f32 %v1467_v8, %v2519_v30 }
0x115f   : > { %1470 = vst.msk [vmem:[%s523_s2] sm:$0xff] %vm533_vm0, %v1469_v9 }
0x1160   : > { %2006 = shalt.err (!%p2003_p9)
}
0x1161   : > { %1689 = dma.vmem_to_hbm [thread:$0]  (%p2233_p4), %s1485_s18, 128, %s1487_s14, %s1472_s15  }
0x1162 PF: > { %s1498_s1 = sand.u32 1, %s2041_s25   ;;  %p2667_p10 = scmp.ge.s32.totalorder %s2053_s28, 2 }
0x1163   : > { %s1499_s23 = scalar_lea.sflag [#allocation5], %s1498_s1 }
0x1164   : > { %p1709_p13 = pnand %p2667_p10, %p2237_p6 }
0x1166   : > { %p1710_p11 = pneg %p1709_p13 }
0x1168   : > { %2036 = dma.done.wait (%p1710_p11), %s1499_s23, 128  }
0x1169   : > { %2038 = vsyncadd (%p1710_p11), %s1499_s23, 4294967168  ;;  %s2668_s28 = sld [smem:[#allocation18_spill]]  ;;  %s2671_s25 = smov %s2045_s26 }
0x116a   : > { %s2669_s7 = sld [smem:[#allocation17_spill]] }
0x116b   : > { %s2670_s27 = sld [smem:[#allocation19_spill]] }
0x116f   : > { %p28_p0 = scmp.ge.s32.totalorder %s2668_s28, 4  }
0x1170   : > { %s2672_s26 = smov %s2669_s7 }
0x1171   :  { %30 = sbr.rel (!%p28_p0) target bundleno = 12 (0xc), region = 145 }
0x1176   :  { %1505 = vsyncpa [#allocation4], 1 }
0x1177   :  { %1507 = vsyncpa [#allocation4 + $0x1], 1 }
0x1178   :  { %1508 = vsyncpa [#allocation7], 1 }
0x1179   :  { %1509 = vsyncpa [#allocation10], 1 }
0x117a   :  { %1510 = vsyncpa [#allocation5], 1 }
0x117b   :  { %1512 = vsyncpa [#allocation5 + $0x1], 1 }

</bundles_post_ra>
